<compile_context>
chip_gen: v7x
topology: tpu7x:2x2x1
jax: 0.10.0
libtpu: 0.0.40
codegen_flags: <defaults>
</compile_context>

<pallas_src>
import math

import jax
import jax.numpy as jnp
from jax.experimental import pallas as pl
from jax.experimental.pallas import tpu as pltpu


def _attn_kernel(x_ref, wq_t_ref, bq_ref, wkv_t_ref, bkv_ref, hsum_ref,
                 wo_t_ref, bo_ref, o_ref):
    """One batch tile of single-token attention.

    x_ref    : (TB, S, E)   input tile (token 0 = query, 1.. = keys/values)
    wq_t_ref : (E, E)       W_q^T
    bq_ref   : (1, E)       b_q
    wkv_t_ref: (E, 2E)      [W_k | W_v]^T
    bkv_ref  : (1, 2E)      [b_k | b_v]
    hsum_ref : (E, E)       scale * [head(e) == head(e')]  (block matrix)
    wo_t_ref : (E, E)       W_o^T
    bo_ref   : (1, E)       b_o
    o_ref    : (TB, E)      output tile
    """
    x = x_ref[...]
    TB, S, E = x.shape
    SK = S - 1

    q_in = x[:, 0, :]                                   # (TB, E)
    kv_in = x[:, 1:, :]                                 # (TB, SK, E)

    # key_padding_mask: True where the whole key embedding is exactly 0.0
    nonzero = (kv_in != 0.0).astype(jnp.float32)
    pad = jnp.max(nonzero, axis=-1, keepdims=True) == 0.0       # (TB, SK, 1)

    # in-projections (pre-transposed weights; f32 accumulation)
    q_p = jnp.dot(q_in, wq_t_ref[...],
                  preferred_element_type=jnp.float32) + bq_ref[...]      # (TB, E)
    kv_p = jnp.dot(kv_in.reshape(TB * SK, E), wkv_t_ref[...],
                   preferred_element_type=jnp.float32) + bkv_ref[...]    # (TB*SK, 2E)
    k_p = kv_p[:, 0:E].reshape(TB, SK, E)
    v_p = kv_p[:, E:2 * E].reshape(TB, SK, E)

    # per-(key, head) dot products, broadcast across each head's lanes
    prod = k_p * q_p[:, None, :]                        # (TB, SK, E)
    scores = jnp.dot(prod.reshape(TB * SK, E).astype(hsum_ref.dtype),
                     hsum_ref[...],
                     preferred_element_type=jnp.float32).reshape(TB, SK, E)

    scores = jnp.where(pad, -jnp.inf, scores)

    # softmax over keys (axis=1); values are replicated within each head's lanes
    m = jnp.max(scores, axis=1, keepdims=True)          # (TB, 1, E)
    p = jnp.exp(scores - m)
    l = jnp.sum(p, axis=1, keepdims=True)               # (TB, 1, E)
    p = p * pl.reciprocal(l, approx=True)

    attn = jnp.sum(p * v_p, axis=1)                     # (TB, E), heads interleaved

    out = jnp.dot(attn.astype(wo_t_ref.dtype), wo_t_ref[...],
                  preferred_element_type=jnp.float32) + bo_ref[...]
    o_ref[...] = out.astype(o_ref.dtype)


def single_token_attention(x, in_proj_w, in_proj_b, out_proj_w, out_proj_b,
                           *, num_heads, block_b=256,
                           compute_dtype=jnp.float32):
    """x: (B, S, E) -> (B, E)."""
    B, S, E = x.shape
    assert E % num_heads == 0
    hd = E // num_heads
    scale = 1.0 / math.sqrt(hd)

    # One-time host-side parameter prep: pre-transpose / pre-split / pack.
    wq_t = in_proj_w[0:E, :].T.astype(compute_dtype)            # (E, E)
    wkv_t = in_proj_w[E:3 * E, :].T.astype(compute_dtype)       # (E, 2E)
    bq = in_proj_b[0:E].reshape(1, E).astype(jnp.float32)
    bkv = in_proj_b[E:3 * E].reshape(1, 2 * E).astype(jnp.float32)
    wo_t = out_proj_w.T.astype(compute_dtype)                   # (E, E)
    bo = out_proj_b.reshape(1, E).astype(jnp.float32)

    head_id = jnp.arange(E) // hd
    hsum = jnp.where(head_id[:, None] == head_id[None, :],
                     scale, 0.0).astype(compute_dtype)          # (E, E)

    # Exact zeros survive an f32->bf16 cast, so the in-kernel padding mask is
    # identical to one computed on the original f32 input.
    x = x.astype(compute_dtype)

    # Batch tile: multiple of 8 sublanes (or the full batch if smaller).
    tb = min(block_b, B)
    if tb >= 8:
        tb = (tb // 8) * 8
    b_pad = pl.cdiv(B, tb) * tb
    if b_pad != B:
        x = jnp.pad(x, ((0, b_pad - B), (0, 0), (0, 0)))

    out = pl.pallas_call(
        _attn_kernel,
        out_shape=jax.ShapeDtypeStruct((b_pad, E), jnp.float32),
        grid_spec=pltpu.PrefetchScalarGridSpec(
            num_scalar_prefetch=0,
            grid=(b_pad // tb,),
            in_specs=[
                pl.BlockSpec((tb, S, E), lambda b: (b, 0, 0)),    # x tile
                pl.BlockSpec((E, E), lambda b: (0, 0)),           # Wq^T
                pl.BlockSpec((1, E), lambda b: (0, 0)),           # bq
                pl.BlockSpec((E, 2 * E), lambda b: (0, 0)),       # [Wk|Wv]^T
                pl.BlockSpec((1, 2 * E), lambda b: (0, 0)),       # [bk|bv]
                pl.BlockSpec((E, E), lambda b: (0, 0)),           # head-sum matrix
                pl.BlockSpec((E, E), lambda b: (0, 0)),           # Wo^T
                pl.BlockSpec((1, E), lambda b: (0, 0)),           # bo
            ],
            out_specs=pl.BlockSpec((tb, E), lambda b: (b, 0)),
        ),
        compiler_params=pltpu.CompilerParams(
            dimension_semantics=("parallel",)),
    )(x, wq_t, bq, wkv_t, bkv, hsum, wo_t, bo)

    return out[:B]


def _reference(x, wi, bi, wo, bo, num_heads):
    """Pure-JAX reference reproducing nn.MultiheadAttention forward."""
    B, S, E = x.shape
    hd = E // num_heads
    q = x[:, 0:1]
    kv = x[:, 1:]
    pad = jnp.all(kv == 0.0, axis=-1)                            # (B, SK)

    qp = q @ wi[:E].T + bi[:E]
    kp = kv @ wi[E:2 * E].T + bi[E:2 * E]
    vp = kv @ wi[2 * E:].T + bi[2 * E:]

    qh = qp.reshape(B, 1, num_heads, hd).transpose(0, 2, 1, 3)
    kh = kp.reshape(B, -1, num_heads, hd).transpose(0, 2, 1, 3)
    vh = vp.reshape(B, -1, num_heads, hd).transpose(0, 2, 1, 3)

    scores = jnp.einsum("bhqd,bhkd->bhqk", qh, kh) / jnp.sqrt(jnp.float32(hd))
    scores = jnp.where(pad[:, None, None, :], -jnp.inf, scores)
    p = jax.nn.softmax(scores, axis=-1)
    o = jnp.einsum("bhqk,bhkd->bhqd", p, vh)
    o = o.transpose(0, 2, 1, 3).reshape(B, 1, E)
    o = o @ wo.T + bo
    return o[:, 0]


if __name__ == "__main__":
    # module defaults: embed_dim=128, num_heads=4; 1 query token + 8 key tokens
    B, S, E, NH = 16, 9, 128, 4

    key = jax.random.PRNGKey(0)
    kx, k1, k2, k3, k4 = jax.random.split(key, 5)

    x = jax.random.normal(kx, (B, S, E), jnp.float32)
    # zero out some key rows (in both batch tiles) to exercise key_padding_mask
    x = x.at[0, S - 1, :].set(0.0)
    x = x.at[3, 1, :].set(0.0)
    x = x.at[10, 4, :].set(0.0)

    in_proj_w = jax.random.normal(k1, (3 * E, E), jnp.float32) * 0.05
    in_proj_b = jax.random.normal(k2, (3 * E,), jnp.float32) * 0.05
    out_proj_w = jax.random.normal(k3, (E, E), jnp.float32) * 0.05
    out_proj_b = jax.random.normal(k4, (E,), jnp.float32) * 0.05

    ref = _reference(x, in_proj_w, in_proj_b, out_proj_w, out_proj_b, NH)

    # f32 path: block_b=8 -> 2 grid steps (keeps both v7x TensorCores busy)
    out = single_token_attention(x, in_proj_w, in_proj_b, out_proj_w,
                                 out_proj_b, num_heads=NH, block_b=8)
    out = jax.block_until_ready(out)
    assert out.shape == (B, E), out.shape
    err = float(jnp.max(jnp.abs(out - ref)))
    assert jnp.allclose(out, ref, atol=2e-3, rtol=2e-3), err

    # bf16 matmul-operand path (halves x HBM traffic, bf16 MXU on v6e/v7x)
    out_bf16 = single_token_attention(x, in_proj_w, in_proj_b, out_proj_w,
                                      out_proj_b, num_heads=NH, block_b=8,
                                      compute_dtype=jnp.bfloat16)
    out_bf16 = jax.block_until_ready(out_bf16)
    err16 = float(jnp.max(jnp.abs(out_bf16 - ref)))
    assert jnp.allclose(out_bf16, ref, atol=5e-2, rtol=5e-2), err16

    print("KERNEL_OK")
</pallas_src>

<mosaic_0001>
module attributes {stable_mosaic.version = 11 : i64} {
  func.func @_attn_kernel(%arg0: i32, %arg1: memref<8x9x128xf32, #tpu.memory_space<vmem>>, %arg2: memref<128x128xf32, #tpu.memory_space<vmem>>, %arg3: memref<1x128xf32, #tpu.memory_space<vmem>>, %arg4: memref<128x256xf32, #tpu.memory_space<vmem>>, %arg5: memref<1x256xf32, #tpu.memory_space<vmem>>, %arg6: memref<128x128xf32, #tpu.memory_space<vmem>>, %arg7: memref<128x128xf32, #tpu.memory_space<vmem>>, %arg8: memref<1x128xf32, #tpu.memory_space<vmem>>, %arg9: memref<8x128xf32, #tpu.memory_space<vmem>>) attributes {dimension_semantics = [#tpu.dimension_semantics<parallel>], iteration_bounds = array<i64: 2>, scalar_prefetch = 0 : i64, scratch_operands = 0 : i64, tpu.core_type = #tpu.core_type<tc>, window_params = [{transform_indices = @transform_0, window_bounds = array<i64: 8, 9, 128>}, {pipeline_mode = #tpu.pipeline_mode<synchronous>, transform_indices = @transform_1, window_bounds = array<i64: 128, 128>}, {pipeline_mode = #tpu.pipeline_mode<synchronous>, transform_indices = @transform_2, window_bounds = array<i64: 1, 128>}, {pipeline_mode = #tpu.pipeline_mode<synchronous>, transform_indices = @transform_3, window_bounds = array<i64: 128, 256>}, {pipeline_mode = #tpu.pipeline_mode<synchronous>, transform_indices = @transform_4, window_bounds = array<i64: 1, 256>}, {pipeline_mode = #tpu.pipeline_mode<synchronous>, transform_indices = @transform_5, window_bounds = array<i64: 128, 128>}, {pipeline_mode = #tpu.pipeline_mode<synchronous>, transform_indices = @transform_6, window_bounds = array<i64: 128, 128>}, {pipeline_mode = #tpu.pipeline_mode<synchronous>, transform_indices = @transform_7, window_bounds = array<i64: 1, 128>}, {transform_indices = @transform_8, window_bounds = array<i64: 8, 128>}]} {
    %c0 = arith.constant 0 : index
    %c0_0 = arith.constant 0 : index
    %c0_1 = arith.constant 0 : index
    %0 = vector.load %arg1[%c0, %c0_0, %c0_1] : memref<8x9x128xf32, #tpu.memory_space<vmem>>, vector<8x9x128xf32>
    %1 = vector.extract_strided_slice %0 {offsets = [0, 0, 0], sizes = [8, 1, 128], strides = [1, 1, 1]} : vector<8x9x128xf32> to vector<8x1x128xf32>
    %2 = vector.shape_cast %1 : vector<8x1x128xf32> to vector<8x128xf32>
    %3 = vector.extract_strided_slice %0 {offsets = [0, 1, 0], sizes = [8, 8, 128], strides = [1, 1, 1]} : vector<8x9x128xf32> to vector<8x8x128xf32>
    %cst = arith.constant 0.000000e+00 : f32
    %4 = vector.broadcast %cst : f32 to vector<8x8x128xf32>
    %5 = arith.cmpf one, %3, %4 : vector<8x8x128xf32>
    %6 = arith.extui %5 : vector<8x8x128xi1> to vector<8x8x128xi32>
    %7 = arith.sitofp %6 : vector<8x8x128xi32> to vector<8x8x128xf32>
    %cst_2 = arith.constant dense<0xFF800000> : vector<8x8xf32>
    %8 = vector.multi_reduction <maximumf>, %7, %cst_2 [2] : vector<8x8x128xf32> to vector<8x8xf32>
    %9 = vector.shape_cast %8 : vector<8x8xf32> to vector<8x8x1xf32>
    %cst_3 = arith.constant 0.000000e+00 : f32
    %10 = vector.broadcast %cst_3 : f32 to vector<8x8x1xf32>
    %11 = arith.cmpf oeq, %9, %10 : vector<8x8x1xf32>
    %c0_4 = arith.constant 0 : index
    %c0_5 = arith.constant 0 : index
    %12 = vector.load %arg2[%c0_4, %c0_5] : memref<128x128xf32, #tpu.memory_space<vmem>>, vector<128x128xf32>
    %cst_6 = arith.constant dense<0.000000e+00> : vector<8x128xf32>
    %13 = tpu.matmul %2, %12, %cst_6 {dimension_numbers = #tpu.dot_dimension_numbers<[1], [0], [0], [1], [0, 0, 1, 1], [], []>} : vector<8x128xf32>, vector<128x128xf32>, vector<8x128xf32> -> vector<8x128xf32>
    %c0_7 = arith.constant 0 : index
    %c0_8 = arith.constant 0 : index
    %14 = vector.load %arg3[%c0_7, %c0_8] : memref<1x128xf32, #tpu.memory_space<vmem>>, vector<1x128xf32>
    %15 = vector.broadcast %14 : vector<1x128xf32> to vector<8x128xf32>
    %16 = arith.addf %13, %15 : vector<8x128xf32>
    %17 = vector.shape_cast %3 : vector<8x8x128xf32> to vector<64x128xf32>
    %c0_9 = arith.constant 0 : index
    %c0_10 = arith.constant 0 : index
    %18 = vector.load %arg4[%c0_9, %c0_10] : memref<128x256xf32, #tpu.memory_space<vmem>>, vector<128x256xf32>
    %cst_11 = arith.constant dense<0.000000e+00> : vector<64x256xf32>
    %19 = tpu.matmul %17, %18, %cst_11 {dimension_numbers = #tpu.dot_dimension_numbers<[1], [0], [0], [1], [0, 0, 1, 1], [], []>} : vector<64x128xf32>, vector<128x256xf32>, vector<64x256xf32> -> vector<64x256xf32>
    %c0_12 = arith.constant 0 : index
    %c0_13 = arith.constant 0 : index
    %20 = vector.load %arg5[%c0_12, %c0_13] : memref<1x256xf32, #tpu.memory_space<vmem>>, vector<1x256xf32>
    %21 = vector.broadcast %20 : vector<1x256xf32> to vector<64x256xf32>
    %22 = arith.addf %19, %21 : vector<64x256xf32>
    %23 = vector.extract_strided_slice %22 {offsets = [0, 0], sizes = [64, 128], strides = [1, 1]} : vector<64x256xf32> to vector<64x128xf32>
    %24 = vector.shape_cast %23 : vector<64x128xf32> to vector<8x8x128xf32>
    %25 = vector.extract_strided_slice %22 {offsets = [0, 128], sizes = [64, 128], strides = [1, 1]} : vector<64x256xf32> to vector<64x128xf32>
    %26 = vector.shape_cast %25 : vector<64x128xf32> to vector<8x8x128xf32>
    %27 = vector.shape_cast %16 : vector<8x128xf32> to vector<8x1x128xf32>
    %28 = vector.broadcast %27 : vector<8x1x128xf32> to vector<8x8x128xf32>
    %29 = arith.mulf %24, %28 : vector<8x8x128xf32>
    %30 = vector.shape_cast %29 : vector<8x8x128xf32> to vector<64x128xf32>
    %c0_14 = arith.constant 0 : index
    %c0_15 = arith.constant 0 : index
    %31 = vector.load %arg6[%c0_14, %c0_15] : memref<128x128xf32, #tpu.memory_space<vmem>>, vector<128x128xf32>
    %cst_16 = arith.constant dense<0.000000e+00> : vector<64x128xf32>
    %32 = tpu.matmul %30, %31, %cst_16 {dimension_numbers = #tpu.dot_dimension_numbers<[1], [0], [0], [1], [0, 0, 1, 1], [], []>} : vector<64x128xf32>, vector<128x128xf32>, vector<64x128xf32> -> vector<64x128xf32>
    %33 = vector.shape_cast %32 : vector<64x128xf32> to vector<8x8x128xf32>
    %cst_17 = arith.constant 0xFF800000 : f32
    %34 = vector.shape_cast %11 : vector<8x8x1xi1> to vector<8x8x1xi1>
    %35 = vector.broadcast %34 : vector<8x8x1xi1> to vector<8x8x128xi1>
    %36 = vector.broadcast %cst_17 : f32 to vector<8x8x128xf32>
    %37 = arith.select %35, %36, %33 : vector<8x8x128xi1>, vector<8x8x128xf32>
    %cst_18 = arith.constant dense<0xFF800000> : vector<8x128xf32>
    %38 = vector.multi_reduction <maximumf>, %37, %cst_18 [1] : vector<8x8x128xf32> to vector<8x128xf32>
    %39 = vector.shape_cast %38 : vector<8x128xf32> to vector<8x1x128xf32>
    %40 = vector.broadcast %39 : vector<8x1x128xf32> to vector<8x8x128xf32>
    %41 = arith.subf %37, %40 : vector<8x8x128xf32>
    %42 = math.exp %41 : vector<8x8x128xf32>
    %cst_19 = arith.constant dense<0.000000e+00> : vector<8x128xf32>
    %43 = vector.multi_reduction <add>, %42, %cst_19 [1] : vector<8x8x128xf32> to vector<8x128xf32>
    %44 = vector.shape_cast %43 : vector<8x128xf32> to vector<8x1x128xf32>
    %45 = tpu.reciprocal %44 {approx = true} : vector<8x1x128xf32> -> vector<8x1x128xf32>
    %46 = vector.broadcast %45 : vector<8x1x128xf32> to vector<8x8x128xf32>
    %47 = arith.mulf %42, %46 : vector<8x8x128xf32>
    %48 = arith.mulf %47, %26 : vector<8x8x128xf32>
    %cst_20 = arith.constant dense<0.000000e+00> : vector<8x128xf32>
    %49 = vector.multi_reduction <add>, %48, %cst_20 [1] : vector<8x8x128xf32> to vector<8x128xf32>
    %c0_21 = arith.constant 0 : index
    %c0_22 = arith.constant 0 : index
    %50 = vector.load %arg7[%c0_21, %c0_22] : memref<128x128xf32, #tpu.memory_space<vmem>>, vector<128x128xf32>
    %cst_23 = arith.constant dense<0.000000e+00> : vector<8x128xf32>
    %51 = tpu.matmul %49, %50, %cst_23 {dimension_numbers = #tpu.dot_dimension_numbers<[1], [0], [0], [1], [0, 0, 1, 1], [], []>} : vector<8x128xf32>, vector<128x128xf32>, vector<8x128xf32> -> vector<8x128xf32>
    %c0_24 = arith.constant 0 : index
    %c0_25 = arith.constant 0 : index
    %52 = vector.load %arg8[%c0_24, %c0_25] : memref<1x128xf32, #tpu.memory_space<vmem>>, vector<1x128xf32>
    %53 = vector.broadcast %52 : vector<1x128xf32> to vector<8x128xf32>
    %54 = arith.addf %51, %53 : vector<8x128xf32>
    %c0_26 = arith.constant 0 : index
    %c0_27 = arith.constant 0 : index
    %55 = vector.load %arg9[%c0_26, %c0_27] : memref<8x128xf32, #tpu.memory_space<vmem>>, vector<8x128xf32>
    tpu.vector_store %arg9[%c0_26, %c0_27], %54 {strides = array<i32>} : memref<8x128xf32, #tpu.memory_space<vmem>>, vector<8x128xf32>,
    return
  }
  func.func @transform_0(%arg0: i32) -> (i32, i32, i32) {
    %c0_i32 = arith.constant 0 : i32
    %c0_i32_0 = arith.constant 0 : i32
    %c0_i32_1 = arith.constant 0 : i32
    return %arg0, %c0_i32, %c0_i32_0 : i32, i32, i32
  }
  func.func @transform_1(%arg0: i32) -> (i32, i32) {
    %c0_i32 = arith.constant 0 : i32
    %c0_i32_0 = arith.constant 0 : i32
    %c0_i32_1 = arith.constant 0 : i32
    return %c0_i32, %c0_i32_0 : i32, i32
  }
  func.func @transform_2(%arg0: i32) -> (i32, i32) {
    %c0_i32 = arith.constant 0 : i32
    %c0_i32_0 = arith.constant 0 : i32
    %c0_i32_1 = arith.constant 0 : i32
    return %c0_i32, %c0_i32_0 : i32, i32
  }
  func.func @transform_3(%arg0: i32) -> (i32, i32) {
    %c0_i32 = arith.constant 0 : i32
    %c0_i32_0 = arith.constant 0 : i32
    %c0_i32_1 = arith.constant 0 : i32
    return %c0_i32, %c0_i32_0 : i32, i32
  }
  func.func @transform_4(%arg0: i32) -> (i32, i32) {
    %c0_i32 = arith.constant 0 : i32
    %c0_i32_0 = arith.constant 0 : i32
    %c0_i32_1 = arith.constant 0 : i32
    return %c0_i32, %c0_i32_0 : i32, i32
  }
  func.func @transform_5(%arg0: i32) -> (i32, i32) {
    %c0_i32 = arith.constant 0 : i32
    %c0_i32_0 = arith.constant 0 : i32
    %c0_i32_1 = arith.constant 0 : i32
    return %c0_i32, %c0_i32_0 : i32, i32
  }
  func.func @transform_6(%arg0: i32) -> (i32, i32) {
    %c0_i32 = arith.constant 0 : i32
    %c0_i32_0 = arith.constant 0 : i32
    %c0_i32_1 = arith.constant 0 : i32
    return %c0_i32, %c0_i32_0 : i32, i32
  }
  func.func @transform_7(%arg0: i32) -> (i32, i32) {
    %c0_i32 = arith.constant 0 : i32
    %c0_i32_0 = arith.constant 0 : i32
    %c0_i32_1 = arith.constant 0 : i32
    return %c0_i32, %c0_i32_0 : i32, i32
  }
  func.func @transform_8(%arg0: i32) -> (i32, i32) {
    %c0_i32 = arith.constant 0 : i32
    %c0_i32_0 = arith.constant 0 : i32
    return %arg0, %c0_i32 : i32, i32
  }
}

</mosaic_0001>

<bundles_post_ra>
// kernel: tpu_custom_call.1
= control target key start
LH: loop header
LB: loop body
LE: loop exit
PB: predicated region body
PF: predicated region fallthrough
CT: control target
= control target key end

     0   :  { %13 = vsyncpa [#allocation3], 0  ;;  %s3022_s0 = inlined_call_operand.vmem [shape: f32[16,9,128], index: 0, kind: input, shape index: {}]   ;;  %s3023_s1 = inlined_call_operand.vmem [shape: f32[128,128], index: 1, kind: input, shape index: {}]   ;;  %s3024_s2 = inlined_call_operand.vmem [shape: f32[1,128], index: 2, kind: input, shape index: {}]   ;;  %s3025_s3 = inlined_call_operand.vmem [shape: f32[128,256], index: 3, kind: input, shape index: {}]   ;;  %s3026_s4 = inlined_call_operand.vmem [shape: f32[1,256], index: 4, kind: input, shape index: {}]   ;;  %s3027_s5 = inlined_call_operand.hbm [shape: f32[128,128], index: 5, kind: input, shape index: {}]   ;;  %s3028_s6 = inlined_call_operand.hbm [shape: f32[128,128], index: 6, kind: input, shape index: {}]   ;;  %s3029_s7 = inlined_call_operand.vmem [shape: f32[1,128], index: 7, kind: input, shape index: {}]   ;;  %s3030_s8 = inlined_call_operand.hbm [shape: f32[16,128], index: 8, kind: output, shape index: {}]  }
   0x1   :  { %14 = vsyncpa [#allocation6], 0 }
   0x2   :  { %15 = vsyncpa [#allocation4], 0 }
   0x3   :  { %17 = vsyncpa [#allocation4 + $0x1], 0  ;;  %s2276_s27 = smov 0   ;;  %s2278_s28 = smov 0  }
   0x4   :  { %s2280_s29 = smov 0   ;;  %s2282_s30 = smov 0  }
   0x5 LB: > { %3035 = sst [smem:[#allocation11_spill]] %s2216_s29  ;;  %s2297_s9 = sadd.s32 4294967295, %s2220_s30   ;;  %s2220_s30 = sphi %s2282_s30, %s3053_s30   ;;  %s2216_s29 = sphi %s2280_s29, %s3050_s29   ;;  %s2212_s28 = sphi %s2278_s28, %s3052_s28   ;;  %s2208_s27 = sphi %s2276_s27, %s3051_s27  }
   0x6   : > { %s1661_s10 = sadd.s32 4294967294, %s2220_s30   ;;  %s2301_s11 = sadd.s32 1, %s2220_s30  }
   0x7   : > { %s203_s12 = sadd.s32 1, %s2216_s29  ;;  %s200_s13 = ssub.s32 %s2220_s30, %s2301_s11 }
   0x8   : > { %p213_p0 = scmp.ne.s32.totalorder %s2216_s29, %s2212_s28  ;;  %p201_p1 = scmp.eq.s32.totalorder %s200_s13, 0 }
   0x9   : > { %p214_p2 = scmp.eq.s32.totalorder %s2297_s9, 1  ;;  %p219_p3 = scmp.ne.s32.totalorder %s2212_s28, %s2208_s27 }
   0xa   : > { %p220_p4 = scmp.eq.s32.totalorder %s1661_s10, 1  ;;  %p1662_p7 = scmp.ge.s32.totalorder %s2220_s30, 1 }
   0xb   : > { %s2312_s14 = scalar_select %p201_p1, %s2216_s29, %s203_s12  }
   0xc   : > { %p2314_p5 = por %p214_p2, %p213_p0  ;;  %p2318_p6 = por %p220_p4, %p219_p3 }
   0xd   : > { %3036 = sst [smem:[#allocation12_spill]] %s2312_s14  ;;  %p227_p8 = scmp.lt.s32.totalorder %s2220_s30, 3 }
   0xe   : > { %s3037_s15 = scalar_select %p2314_p5, 1, 0 }
   0xf   : > { %s3038_s16 = scalar_select %p2318_p6, 1, 0 }
  0x10   : > { %p3031_p9 = scmp.eq.s32.totalorder %s2297_s9, 0  ;;  %p2325_p10 = pnand %p1662_p7, %p227_p8 }
  0x11   : > { %s2222_s18 = smov [#allocation2]   ;;  %s2223_s21 = smov [#allocation5]  }
  0x12   : > { %s3039_s17 = scalar_select %p2325_p10, 1, 0 }
  0x13   : > { %s251_s19 = sshll.u32 %s2222_s18, 4  ;;  %p1990_p11 = pneg %p2325_p10  ;;  %s252_s19 = int_to_ptr.vmem [resolvable:$true] %s251_s19 }
  0x14   : > { %s264_s22 = sshll.u32 %s2223_s21, 4  ;;  %s2094_s25 = scalar_lea.hbm %s3027_s5, 2048  ;;  %s2337_s22 = int_to_ptr.vmem [resolvable:$true] %s264_s22 }
  0x15   : > { %p2333_p12 = pnand %p3031_p9, %p1990_p11  ;;  %p2095_p13 = scmp.ne.s32.totalorder %s3027_s5, %s2094_s25 }
  0x16   : > { %p2101_p3 = scmp.lt.u32.totalorder %s2094_s25, %s3027_s5 }
  0x17   : > { %p2096_p0 = pneg %p2333_p12 }
  0x19   : > { %p2097_p1 = pnand %p2096_p0, %p2095_p13 }
  0x1b   : > { %p2098_p2 = pneg %p2097_p1 }
  0x1d   : > { %p2103_p4 = pnand %p2101_p3, %p2098_p2 }
  0x1f   : > { %2106 = shalt.err (!%p2103_p4)
}
  0x20   : > { %s2107_s18 = scalar_lea.vmem %s252_s19, 2048  ;;  %p2115_p9 = scmp.lt.s32.totalorder %s252_s19, %s252_s19 }
  0x21   : > { %p2108_p7 = scmp.ne.s32.totalorder %s252_s19, %s2107_s18  ;;  %p2116_p6 = scmp.lt.s32.totalorder %s2107_s18, %s2107_s18 }
  0x23   : > { %p2110_p8 = pnand %p2108_p7, %p2096_p0  ;;  %p2117_p5 = por %p2116_p6, %p2115_p9 }
  0x25   : > { %p2111_p11 = pneg %p2110_p8 }
  0x27   : > { %p2118_p10 = pnand %p2117_p5, %p2111_p11 }
  0x29   : > { %2121 = shalt.err (!%p2118_p10)
}
  0x2a   : > { %s2224_s21 = smov 128   ;;  %s2225_s23 = smov 8  }
  0x2b   : > { %1993 = dma.hbm_to_vmem [thread:$0]  (!%p2333_p12), %s3027_s5, 2048, %s252_s19, [#allocation3], %s2224_s21, %s2224_s21, %s2225_s23  }
  0x2c   : > { %s2122_s12 = scalar_lea.hbm %s3028_s6, 2048 }
  0x2d   : > { %p2123_p13 = scmp.ne.s32.totalorder %s3028_s6, %s2122_s12  ;;  %p2129_p9 = scmp.lt.u32.totalorder %s2122_s12, %s3028_s6 }
  0x2f   : > { %p2125_p5 = pnand %p2123_p13, %p2096_p0 }
  0x31   : > { %p2126_p6 = pneg %p2125_p5 }
  0x33   : > { %p2131_p10 = pnand %p2129_p9, %p2126_p6 }
  0x35   : > { %2134 = shalt.err (!%p2131_p10)
}
  0x36   : > { %s2135_s19 = scalar_lea.vmem %s2337_s22, 2048  ;;  %p2143_p4 = scmp.lt.s32.totalorder %s2337_s22, %s2337_s22 }
  0x37   : > { %p2136_p1 = scmp.ne.s32.totalorder %s2337_s22, %s2135_s19  ;;  %p2144_p7 = scmp.lt.s32.totalorder %s2135_s19, %s2135_s19 }
  0x39   : > { %p2138_p2 = pnand %p2136_p1, %p2096_p0  ;;  %p2145_p8 = por %p2144_p7, %p2143_p4 }
  0x3b   : > { %p2139_p3 = pneg %p2138_p2 }
  0x3d   : > { %p2146_p11 = pnand %p2145_p8, %p2139_p3 }
  0x3f   : > { %2149 = shalt.err (!%p2146_p11)
}
  0x40   : > { %1996 = dma.hbm_to_vmem [thread:$0]  (!%p2333_p12), %s3028_s6, 2048, %s2337_s22, [#allocation6], %s2224_s21, %s2224_s21, %s2225_s23  }
  0x41   : > { %p3041_p13 = scmp.ne.s32.totalorder %s3039_s17, 0 }
  0x42   : > { %p3042_p5 = scmp.eq.s32.totalorder (!%p3041_p13), %s2297_s9, 0 }
  0x43   : > { %293 = sbr.rel (%p3041_p13) target bundleno = 896 (0x380), region = 52 }
  0x4a   : > { %2195 = dma.done.wait (%p3042_p5), [#allocation3], 2048   ;;  %p3043_p0 = pmov %p3042_p5 }
  0x4c   : > { %2197 = vsyncadd (%p3043_p0), [#allocation3], 4294965248  ;;  %p3044_p6 = pmov %p3043_p0 }
  0x4d   : > { %p3045_p9 = pmov %p3043_p0 }
  0x4e   : > { %2199 = dma.done.wait (%p3044_p6), [#allocation6], 2048  }
  0x4f   : > { %2201 = vsyncadd (%p3045_p9), [#allocation6], 4294965248  ;;  %v2226_v0 = vmov 0.0|0.0   ;;  %vm2227_vm0 = vmmov 0   ;;  %v2228_v1 = vmov 0.0   ;;  %s1670_s17 = sshll.u32 %s2297_s9, 3 }
  0x50   : > { %1868 = vmatprep.subr.bf16.mxu0 %v2226_v0  ;;  %1786 = vmatprep.mubr.msk.f32.mxu0 %vm2227_vm0, %v2228_v1  ;;  %v469_v2 = vld [vmem:[%s3023_s1] sm:$0xff]  ;;  %v470_v3 = vld [vmem:[%s3023_s1 + $0x8] sm:$0xff]  ;;  %v635_v6 = vld [vmem:[%s3025_s3 + $0x18] sm:$0xff]  ;;  %p2430_p12 = scmp.lt.s32.totalorder %s1670_s17, 15  ;;  %vm501_vm1 = vcmask 1041409   ;;  %vm504_vm2 = vcmask 1042434  }
  0x51   : > { %740 = vmatprep.mubr.f32.mxu1 %v2228_v1  ;;  %v633_v4 = vld [vmem:[%s3025_s3 + $0x8] sm:$0xff]  ;;  %v1869_v5 = vpack.c.bf16 %v470_v3, %v469_v2  ;;  %v632_v7 = vld [vmem:[%s3025_s3] sm:$0xff]  ;;  %v634_v8 = vld [vmem:[%s3025_s3 + $0x10] sm:$0xff]  ;;  %vm507_vm3 = vcmask 1043459   ;;  %vm510_vm4 = vcmask 1044484   ;;  %vm513_vm5 = vcmask 1045509  }
  0x52   : > { %v1892_v9 = vpack.c.bf16 %v635_v6, %v633_v4  ;;  %v1894_v10 = vpack.c.bf16 %v634_v8, %v632_v7  ;;  %v471_v11 = vld [vmem:[%s3023_s1 + $0x10] sm:$0xff]  ;;  %v472_v12 = vld [vmem:[%s3023_s1 + $0x18] sm:$0xff]  ;;  %v637_v13 = vld [vmem:[%s3025_s3 + $0x28] sm:$0xff]  ;;  %s3055_s17 = smov (!%p2430_p12, %s1670_s17), 15  ;;  %vm516_vm6 = vcmask 1046534   ;;  %vm519_vm7 = vcmask 1047559  }
  0x53   : > { %1870 = vmatpush3.bf16.msra.mxu0 %v1869_v5  ;;  %v1872_v14 = vpack.c.bf16 %v472_v12, %v471_v11  ;;  %v639_v15 = vld [vmem:[%s3025_s3 + $0x38] sm:$0xff]  ;;  %v636_v16 = vld [vmem:[%s3025_s3 + $0x20] sm:$0xff]  ;;  %v638_v17 = vld [vmem:[%s3025_s3 + $0x30] sm:$0xff]  ;;  %s1695_s12 = sshll.u32 %s3055_s17, 4  ;;  %vm600_vm8 = vcmask 1046528   ;;  %vm403_vm10 = vcmask 1047553  }
  0x54   : > { %1893 = vmatprep.subr.bf16.mxu1 %v1892_v9  ;;  %1871 = vmatprep.subr.bf16.mxu0 %v2226_v0  ;;  %v1896_v18 = vpack.c.bf16 %v639_v15, %v637_v13  ;;  %v473_v19 = vld [vmem:[%s3023_s1 + $0x20] sm:$0xff]  ;;  %v474_v20 = vld [vmem:[%s3023_s1 + $0x28] sm:$0xff]  ;;  %v1898_v22 = vpack.c.bf16 %v638_v17, %v636_v16  ;;  %v643_v23 = vld [vmem:[%s3025_s3 + $0x58] sm:$0xff]  ;;  %s2501_s24 = scalar_lea.vmem %s3022_s0, %s1695_s12  ;;  %vm407_vm13 = vcmask 1040384   ;;  %s329_s26 = sand.u32 1, %s2212_s28  }
  0x55   : > { %v641_v21 = vld [vmem:[%s3025_s3 + $0x48] sm:$0xff]  ;;  %1895 = vmatpush1.bf16.msra.mxu1 %v1894_v10  ;;  %v640_v25 = vld [vmem:[%s3025_s3 + $0x40] sm:$0xff]  ;;  %v642_v26 = vld [vmem:[%s3025_s3 + $0x50] sm:$0xff]  ;;  %v1875_v27 = vpack.c.bf16 %v474_v20, %v473_v19  ;;  %s1669_s10 = sshll.u32 %s329_s26, 3  ;;  %s1692_s19 = sshll.u32 %s2297_s9, 7 }
  0x56   : > { %1897 = vmatprep.subr.bf16.mxu1 %v1896_v18  ;;  %v1900_v24 = vpack.c.bf16 %v643_v23, %v641_v21  ;;  %v645_v28 = vld [vmem:[%s3025_s3 + $0x68] sm:$0xff]  ;;  %v647_v29 = vld [vmem:[%s3025_s3 + $0x78] sm:$0xff]  ;;  %v475_v30 = vld [vmem:[%s3023_s1 + $0x30] sm:$0xff]  ;;  %v1902_v32 = vpack.c.bf16 %v642_v26, %v640_v25  ;;  %s331_s12 = scalar_lea.vmem [#allocation7], %s1669_s10  ;;  %s2980_s22 = scalar_lea.hbm %s3030_s8, %s1692_s19 }
  0x57   : > { %1873 = vmatpush3.bf16.msra.mxu0 %v1872_v14  ;;  %v476_v31 = vld [vmem:[%s3023_s1 + $0x38] sm:$0xff]  ;;  %v1904_v33 = vpack.c.bf16 %v647_v29, %v645_v28  ;;  %v644_v34 = vld [vmem:[%s3025_s3 + $0x60] sm:$0xff]  ;;  %v646_v35 = vld [vmem:[%s3025_s3 + $0x70] sm:$0xff]  ;;  %s1580_s29 = sshll.u32 %s331_s12, 4  ;;  %s1567_s21 = scalar_lea.sflag [#allocation4], %s329_s26  ;;  %s2982_s29 = int_to_ptr.vmem [resolvable:$true] %s1580_s29 }
  0x58   : > { %1874 = vmatprep.subr.bf16.mxu0 %v2226_v0  ;;  %v1878_v36 = vpack.c.bf16 %v476_v31, %v475_v30  ;;  %v649_v37 = vld [vmem:[%s3025_s3 + $0x88] sm:$0xff]  ;;  %v651_v38 = vld [vmem:[%s3025_s3 + $0x98] sm:$0xff]  ;;  %v477_v39 = vld [vmem:[%s3023_s1 + $0x40] sm:$0xff]  ;;  %v1906_v41 = vpack.c.bf16 %v646_v35, %v644_v34  ;;  %p3047_p1 = scmp.ne.s32.totalorder %s3037_s15, 0  ;;  %s2230_s9 = smov [#allocation7]  }
  0x59   : > { %1899 = vmatpush1.bf16.msra.mxu1 %v1898_v22  ;;  %v478_v40 = vld [vmem:[%s3023_s1 + $0x48] sm:$0xff]  ;;  %v1908_v42 = vpack.c.bf16 %v651_v38, %v649_v37  ;;  %v648_v43 = vld [vmem:[%s3025_s3 + $0x80] sm:$0xff]  ;;  %v650_v44 = vld [vmem:[%s3025_s3 + $0x90] sm:$0xff]  ;;  %s2154_s17 = sshll.u32 %s2230_s9, 4  ;;  %s2155_s17 = int_to_ptr.vmem [resolvable:$false] %s2154_s17 }
  0x5a   : > { %1901 = vmatprep.subr.bf16.mxu1 %v1900_v24  ;;  %v479_v45 = vld [vmem:[%s3023_s1 + $0x50] sm:$0xff]  ;;  %v1881_v46 = vpack.c.bf16 %v478_v40, %v477_v39  ;;  %v480_v47 = vld [vmem:[%s3023_s1 + $0x58] sm:$0xff]  ;;  %v653_v48 = vld [vmem:[%s3025_s3 + $0xa8] sm:$0xff]  ;;  %v1910_v53 = vpack.c.bf16 %v650_v44, %v648_v43  ;;  %s2156_s23 = scalar_lea.vmem %s2155_s17, 256  ;;  %p2157_p4 = scmp.lt.s32.totalorder %s2982_s29, %s2155_s17 }
  0x5b   : > { %1876 = vmatpush3.bf16.msra.mxu0 %v1875_v27  ;;  %v655_v49 = vld [vmem:[%s3025_s3 + $0xb8] sm:$0xff]  ;;  %v2523_v50 = vld [vmem:[%s2501_s24] sm:$0xff]  ;;  %v2526_v51 = vld [vmem:[%s2501_s24 + $0x10] sm:$0xff]  ;;  %v1884_v2 = vpack.c.bf16 %v480_v47, %v479_v45 }
  0x5c   : > { %1877 = vmatprep.subr.bf16.mxu0 %v2226_v0  ;;  %v2529_v52 = vld [vmem:[%s2501_s24 + $0x20] sm:$0xff]  ;;  %v2532_v54 = vld [vmem:[%s2501_s24 + $0x30] sm:$0xff]  ;;  %v500_v56 = vrot.slane %v2526_v51, 7  ;;  %v1912_v58 = vpack.c.bf16 %v655_v49, %v653_v48  ;;  %v657_v3 = vld [vmem:[%s3025_s3 + $0xc8] sm:$0xff]  ;;  %v601_v37 = vrot.slane %v2523_v50, 1  ;;  %v604_v45 = vrot.slane %v2526_v51, 1 }
  0x5d   : > { %1903 = vmatpush1.bf16.msra.mxu1 %v1902_v32  ;;  %v2535_v55 = vld [vmem:[%s2501_s24 + $0x40] sm:$0xff]  ;;  %v503_v57 = vrot.slane %v2529_v52, 6  ;;  %v654_v60 = vld [vmem:[%s3025_s3 + $0xb0] sm:$0xff]  ;;  %v506_v62 = vrot.slane %v2532_v54, 5  ;;  %v659_v4 = vld [vmem:[%s3025_s3 + $0xd8] sm:$0xff]  ;;  %vm357_vm9 = vcmp.ne.f32.partialorder %v2526_v51, 0.0 }
  0x5e   : > { %1905 = vmatprep.subr.bf16.mxu1 %v1904_v33  ;;  %v652_v59 = vld [vmem:[%s3025_s3 + $0xa0] sm:$0xff]  ;;  %v2546_v61 = vld [vmem:[%s2501_s24 + $0x50] sm:$0xff]  ;;  %v509_v63 = vrot.slane %v2535_v55, 4  ;;  %v502_v5 = vsel %vm501_vm1, %v500_v56, %v2523_v50  ;;  %v482_v7 = vld [vmem:[%s3023_s1 + $0x68] sm:$0xff]  ;;  %v1916_v13 = vpack.c.bf16 %v659_v4, %v657_v3  ;;  %v610_v3 = vrot.slane %v2532_v54, 1 }
  0x5f   : > { %1879 = vmatpush3.bf16.msra.mxu0 %v1878_v36  ;;  %v481_v6 = vld [vmem:[%s3023_s1 + $0x60] sm:$0xff]  ;;  %v505_v8 = vsel %vm504_vm2, %v503_v57, %v502_v5  ;;  %v1914_v9 = vpack.c.bf16 %v654_v60, %v652_v59  ;;  %v512_v12 = vrot.slane %v2546_v61, 3  ;;  %v658_v15 = vld [vmem:[%s3025_s3 + $0xd0] sm:$0xff]  ;;  %v661_v18 = vld [vmem:[%s3025_s3 + $0xe8] sm:$0xff]  ;;  %v607_v57 = vrot.slane %v2529_v52, 1 }
  0x60   : > { %1880 = vmatprep.subr.bf16.mxu0 %v2226_v0  ;;  %v2567_v10 = vld [vmem:[%s2501_s24 + $0x60] sm:$0xff]  ;;  %v508_v11 = vsel %vm507_vm3, %v506_v62, %v505_v8  ;;  %v1887_v17 = vpack.c.bf16 %v482_v7, %v481_v6  ;;  %v663_v19 = vld [vmem:[%s3025_s3 + $0xf8] sm:$0xff]  ;;  %v483_v20 = vld [vmem:[%s3023_s1 + $0x70] sm:$0xff]  ;;  %vm355_vm11 = vcmp.ne.f32.partialorder %v2523_v50, 0.0 }
  0x61   : > { %1907 = vmatpush1.bf16.msra.mxu1 %v1906_v41  ;;  %v656_v14 = vld [vmem:[%s3025_s3 + $0xc0] sm:$0xff]  ;;  %v511_v16 = vsel %vm510_vm4, %v509_v63, %v508_v11  ;;  %v484_v21 = vld [vmem:[%s3023_s1 + $0x78] sm:$0xff]  ;;  %v2592_v22 = vld [vmem:[%s2501_s24 + $0x70] sm:$0xff]  ;;  %v515_v23 = vrot.slane %v2567_v10, 2  ;;  %v1920_v28 = vpack.c.bf16 %v663_v19, %v661_v18  ;;  %v613_v11 = vrot.slane %v2535_v55, 1 }
  0x62   : > { %1909 = vmatprep.subr.bf16.mxu1 %v1908_v42  ;;  %v1918_v24 = vpack.c.bf16 %v658_v15, %v656_v14  ;;  %v514_v25 = vsel %vm513_vm5, %v512_v12, %v511_v16  ;;  %v887_v26 = vld [vmem:[#allocation2] sm:$0xff]  ;;  %v888_v27 = vld [vmem:[#allocation2 + $0x8] sm:$0xff]  ;;  %v662_v30 = vld [vmem:[%s3025_s3 + $0xf0] sm:$0xff]  ;;  %v1890_v32 = vpack.c.bf16 %v484_v21, %v483_v20  ;;  %v518_v33 = vrot.slane %v2592_v22, 1 }
  0x63   : > { %1882 = vmatpush3.bf16.msra.mxu0 %v1881_v46  ;;  %v660_v29 = vld [vmem:[%s3025_s3 + $0xe0] sm:$0xff]  ;;  %v2603_v31 = vld [vmem:[%s2501_s24 + $0x8] sm:$0x1]  ;;  %v517_v34 = vsel %vm516_vm6, %v515_v23, %v514_v25  ;;  %v1924_v35 = vpack.c.bf16 %v888_v27, %v887_v26  ;;  %v889_v39 = vld [vmem:[#allocation2 + $0x10] sm:$0xff]  ;;  %v616_v15 = vrot.slane %v2546_v61, 1  ;;  %v619_v19 = vrot.slane %v2567_v10, 1 }
  0x64   : > { %1883 = vmatprep.subr.bf16.mxu0 %v2226_v0  ;;  %v1922_v36 = vpack.c.bf16 %v662_v30, %v660_v29  ;;  %v602_v38 = vrot.slane %v2603_v31, 1  ;;  %v890_v40 = vld [vmem:[#allocation2 + $0x18] sm:$0xff]  ;;  %v520_v42 = vsel %vm519_vm7, %v518_v33, %v517_v34  ;;  %v891_v47 = vld [vmem:[#allocation2 + $0x20] sm:$0xff]  ;;  %v892_v48 = vld [vmem:[#allocation2 + $0x28] sm:$0xff]  ;;  %v666_v26 = vlaneseq }
  0x65   : > { %1911 = vmatpush1.bf16.msra.mxu1 %v1910_v53  ;;  %v2611_v41 = vld [vmem:[%s2501_s24 + $0x18] sm:$0x1]  ;;  %v1928_v43 = vpack.c.bf16 %v890_v40, %v889_v39  ;;  %v2620_v49 = vld [vmem:[%s2501_s24 + $0x28] sm:$0x1]  ;;  %v1932_v53 = vpack.c.bf16 %v892_v48, %v891_v47  ;;  %v893_v59 = vld [vmem:[#allocation2 + $0x30] sm:$0xff]  ;;  %vm356_vm14 = vcmp.ne.f32.partialorder %v2603_v31, 0.0 }
  0x66   : > { %1913 = vmatprep.subr.bf16.mxu1 %v1912_v58  ;;  %v603_v44 = vsel %vm600_vm8, %v601_v37, %v602_v38  ;;  %v605_v46 = vrot.slane %v2611_v41, 1  ;;  %v608_v58 = vrot.slane %v2620_v49, 1  ;;  %v894_v60 = vld [vmem:[#allocation2 + $0x38] sm:$0xff]  ;;  %v895_v5 = vld [vmem:[#allocation2 + $0x40] sm:$0xff]  ;;  %v896_v6 = vld [vmem:[#allocation2 + $0x48] sm:$0xff]  ;;  %v2667_v27 = vshrl.u32 %v666_v26, 7 }
  0x67   : > { %1885 = vmatpush3.bf16.msra.mxu0 %v1884_v2  ;;  %v2628_v62 = vld [vmem:[%s2501_s24 + $0x38] sm:$0x1]  ;;  %v1936_v63 = vpack.c.bf16 %v894_v60, %v893_v59  ;;  %v2635_v7 = vld [vmem:[%s2501_s24 + $0x48] sm:$0x1]  ;;  %v1940_v8 = vpack.c.bf16 %v896_v6, %v895_v5  ;;  %v2672_v30 = vld [vmem:[%s3026_s4] sm:$0x3] }
  0x68   : > { %1886 = vmatprep.subr.bf16.mxu0 %v2226_v0  ;;  %v606_v56 = vsel %vm600_vm8, %v604_v45, %v605_v46  ;;  %v609_v2 = vsel %vm600_vm8, %v607_v57, %v608_v58  ;;  %v611_v4 = vrot.slane %v2628_v62, 1  ;;  %v614_v12 = vrot.slane %v2635_v7, 1  ;;  %v2656_v21 = vld [vmem:[%s2501_s24 + $0x78] sm:$0x1]  ;;  %v901_v38 = vld [vmem:[#allocation2 + $0x70] sm:$0xff] }
  0x69   : > { %1915 = vmatpush1.bf16.msra.mxu1 %v1914_v9  ;;  %v898_v29 = vld [vmem:[#allocation2 + $0x58] sm:$0xff]  ;;  %vm358_vm12 = vcmp.ne.f32.partialorder %v2611_v41, 0.0  ;;  %v1674_v51 = vsel %vm356_vm14, 1.0, %v2228_v1  ;;  %vm360_vm15 = vcmp.ne.f32.partialorder %v2620_v49, 0.0  ;;  %vm363_vm14 = vcmp.ne.f32.partialorder %v2535_v55, 0.0 }
  0x6a   : > { %1917 = vmatprep.subr.bf16.mxu1 %v1916_v13  ;;  %v612_v9 = vsel %vm600_vm8, %v610_v3, %v611_v4  ;;  %v2642_v13 = vld [vmem:[%s2501_s24 + $0x58] sm:$0x1]  ;;  %v615_v14 = vsel %vm600_vm8, %v613_v11, %v614_v12  ;;  %v408_v41 = vsel %vm407_vm13, %v1674_v51, -inf  ;;  %v1678_v47 = vsel %vm360_vm15, 1.0, %v2228_v1  ;;  %v1689_v12 = vld [vmem:[%s3024_s2] ss:$0 sm:$0xff] }
  0x6b   : > { %1888 = vmatpush3.bf16.msra.mxu0 %v1887_v17  ;;  %v617_v16 = vrot.slane %v2642_v13, 1  ;;  %v2649_v17 = vld [vmem:[%s2501_s24 + $0x68] sm:$0x1]  ;;  %v902_v39 = vld [vmem:[#allocation2 + $0x78] sm:$0xff]  ;;  %v420_v31 = vsel %vm407_vm13, %v1678_v47, -inf  ;;  %v1681_v58 = vsel %vm363_vm14, 1.0, %v2228_v1 }
  0x6c   : > { %1889 = vmatprep.subr.bf16.mxu0 %v2226_v0  ;;  %v620_v20 = vrot.slane %v2649_v17, 1  ;;  %v1952_v40 = vpack.c.bf16 %v902_v39, %v901_v38  ;;  %vm366_vm15 = vcmp.ne.f32.partialorder %v2642_v13, 0.0  ;;  %v429_v55 = vsel %vm403_vm10, %v1681_v58, -inf  ;;  %s2150_s24 = scalar_lea.vmem %s2982_s29, 128 }
  0x6d   : > { %1919 = vmatpush1.bf16.msra.mxu1 %v1918_v24  ;;  %v618_v18 = vsel %vm600_vm8, %v616_v15, %v617_v16  ;;  %v622_v24 = vrot.slane %v2656_v21, 1  ;;  %v1684_v60 = vsel %vm366_vm15, 1.0, %v2228_v1  ;;  %vm369_vm14 = vcmp.ne.f32.partialorder %v2592_v22, 0.0  ;;  %p2151_p10 = scmp.ne.s32.totalorder %s2982_s29, %s2150_s24  ;;  %p2158_p7 = scmp.lt.s32.totalorder %s2156_s23, %s2150_s24 }
  0x6e   : > { %1921 = vmatprep.subr.bf16.mxu1 %v1920_v28  ;;  %v621_v23 = vsel %vm600_vm8, %v619_v19, %v620_v20  ;;  %v897_v28 = vld [vmem:[#allocation2 + $0x50] sm:$0xff]  ;;  %v1687_v6 = vsel %vm369_vm14, 1.0, %v2228_v1  ;;  %v2730_v13 = vsub.s32 0, %v2667_v27 }
  0x6f   : > { %1891 = vmatpush3.bf16.msra.mxu0 %v1890_v32  ;;  %v623_v25 = vsel %vm600_vm8, %v518_v33, %v622_v24  ;;  %v672_v32 = vsub.s32 1, %v2667_v27  ;;  %v1944_v34 = vpack.c.bf16 %v898_v29, %v897_v28  ;;  %v899_v33 = vld [vmem:[#allocation2 + $0x60] sm:$0xff]  ;;  %p2152_p2 = pnand %p2151_p10, %p3047_p1  ;;  %p2159_p8 = por %p2158_p7, %p2157_p4 }
  0x70   : > { %1925 = vmatprep.subr.bf16.mxu0 %v1924_v35  ;;  %v669_v19 = vrot.slane %v2672_v30, %v2730_v13 }
  0x71   : > { %1923 = vmatpush1.bf16.msra.mxu1 %v1922_v36  ;;  %v900_v36 = vld [vmem:[#allocation2 + $0x68] sm:$0xff]  ;;  %p2153_p3 = pneg %p2152_p2 }
  0x72   : > { %1787 = vmatmul.mubr.f32.vlgmr.msra.gmra.mrb[0].mxu0 %v520_v42  ;;  %1956 = vmatprep.subr.bf16.mxu1 %v2226_v0  ;;  %v1948_v37 = vpack.c.bf16 %v900_v36, %v899_v33  ;;  %v1675_v42 = vsel %vm357_vm9, 1.0, %v2228_v1  ;;  %vm362_vm9 = vcmp.ne.f32.partialorder %v2628_v62, 0.0 }
  0x73   : > { %1927 = vmatpush3.bf16.msra.mxu0 %v1924_v35  ;;  %v2676_v35 = vrot.slane %v2672_v30, %v672_v32  ;;  %v411_v45 = vsel %vm403_vm10, %v1675_v42, -inf  ;;  %p2160_p11 = pnand %p2159_p8, %p2153_p3 }
  0x74   : > { %741 = vmatmul.mubr.f32.vlgmr.msra.gmra.mrb[0].mxu1 %v603_v44  ;;  %1929 = vmatprep.subr.bf16.mxu0 %v1928_v43  ;;  %v1676_v44 = vsel %vm358_vm12, 1.0, %v2228_v1  ;;  %vm364_vm12 = vcmp.ne.f32.partialorder %v2635_v7, 0.0 }
  0x75   : > { %746 = vmatprep.mubr.f32.mxu1 %v2228_v1  ;;  %412 = vmax.xlane.f32.xlu1 %v411_v45  ;;  %v414_v50 = vsel %vm407_vm13, %v1676_v44, -inf  ;;  %v1682_v57 = vsel %vm364_vm12, 1.0, %v2228_v1  ;;  %vm370_vm12 = vcmp.ne.f32.partialorder %v2656_v21, 0.0 }
  0x76   : > { %v432_v59 = vsel %vm407_vm13, %v1682_v57, -inf  ;;  %v1688_v5 = vsel %vm370_vm12, 1.0, %v2228_v1 }
  0x77   : > { %1931 = vmatpush3.bf16.msra.mxu0 %v1928_v43  ;;  %v1673_v43 = vsel %vm355_vm11, 1.0, %v2228_v1  ;;  %vm361_vm11 = vcmp.ne.f32.partialorder %v2532_v54, 0.0  ;;  %v450_v7 = vsel %vm407_vm13, %v1688_v5, -inf }
  0x78   : > { %747 = vmatmul.mubr.f32.gmra.mrb[2].mxu1 %v606_v56  ;;  %1933 = vmatprep.subr.bf16.mxu0 %v1932_v53  ;;  %v404_v46 = vsel %vm403_vm10, %v1673_v43, -inf }
  0x79   : > { %752 = vmatprep.mubr.f32.mxu1 %v2228_v1  ;;  %405 = vmax.xlane.f32.xlu0 %v404_v46 }
  0x7a   : > { %415 = vmax.xlane.f32.xlu1 %v414_v50 }
  0x7b   : > { %1935 = vmatpush3.bf16.msra.mxu0 %v1932_v53  ;;  %v1679_v53 = vsel %vm361_vm11, 1.0, %v2228_v1  ;;  %vm367_vm11 = vcmp.ne.f32.partialorder %v2567_v10, 0.0 }
  0x7c   : > { %753 = vmatmul.mubr.f32.gmra.mrb[4].mxu1 %v609_v2  ;;  %1937 = vmatprep.subr.bf16.mxu0 %v1936_v63  ;;  %v423_v54 = vsel %vm403_vm10, %v1679_v53, -inf  ;;  %v1685_v3 = vsel %vm367_vm11, 1.0, %v2228_v1 }
  0x7d   : > { %758 = vmatprep.mubr.f32.mxu1 %v2228_v1  ;;  %409 = vmax.xlane.f32.xlu0 %v408_v41  ;;  %v441_v10 = vsel %vm403_vm10, %v1685_v3, -inf }
  0x7e   : > { %421 = vmax.xlane.f32.xlu1 %v420_v31 }
  0x7f   : > { %1939 = vmatpush3.bf16.msra.mxu0 %v1936_v63  ;;  %v438_v63 = vsel %vm407_vm13, %v1684_v60, -inf }
  0x80   : > { %759 = vmatmul.mubr.f32.gmra.mrb[6].mxu1 %v612_v9  ;;  %1941 = vmatprep.subr.bf16.mxu0 %v1940_v8  ;;  %v2229_v9 = vmov 1966171168  }
  0x81   : > { %764 = vmatprep.mubr.f32.mxu1 %v2228_v1  ;;  %v792_v22 = vunpack.c.l.s4 %v2229_v9 }
  0x83   : > { %1943 = vmatpush3.bf16.msra.mxu0 %v1940_v8  ;;  %v447_v8 = vsel %vm403_vm10, %v1687_v6, -inf  ;;  %v793_v11 = vunpack.c.0.s8 %v792_v22 }
  0x84   : > { %765 = vmatmul.mubr.f32.gmra.mrb[8].mxu1 %v615_v14  ;;  %1945 = vmatprep.subr.bf16.mxu0 %v1944_v34 }
  0x85   : > { %770 = vmatprep.mubr.f32.mxu1 %v2228_v1 }
  0x87   : > { %1947 = vmatpush3.bf16.msra.mxu0 %v1944_v34 }
  0x88   : > { %771 = vmatmul.mubr.f32.gmra.mrb[10].mxu1 %v618_v18  ;;  %1949 = vmatprep.subr.bf16.mxu0 %v1948_v37 }
  0x89   : > { %776 = vmatprep.mubr.f32.mxu1 %v2228_v1 }
  0x8b   : > { %1951 = vmatpush3.bf16.msra.mxu0 %v1948_v37 }
  0x8c   : > { %777 = vmatmul.mubr.f32.gmra.mrb[12].mxu1 %v621_v23  ;;  %1953 = vmatprep.subr.bf16.mxu0 %v1952_v40 }
  0x8d   : > { %782 = vmatprep.mubr.f32.mxu1 %v2228_v1 }
  0x8f   : > { %1955 = vmatpush3.bf16.msra.mxu0 %v1952_v40 }
  0x90   : > { %783 = vmatmul.mubr.f32.gmra.mrb[14].mxu1 %v623_v25 }
  0x91   : > { %1865 = vmatprep.mubr.msk.f32.mxu1 %vm2227_vm0, %v2228_v1  ;;  %vm359_vm0 = vcmp.ne.f32.partialorder %v2529_v52, 0.0  ;;  %v1680_v52 = vsel %vm362_vm9, 1.0, %v2228_v1  ;;  %vm368_vm9 = vcmp.ne.f32.partialorder %v2649_v17, 0.0 }
  0x92   : > { %v1677_v48 = vsel %vm359_vm0, 1.0, %v2228_v1  ;;  %v426_v56 = vsel %vm407_vm13, %v1680_v52, -inf  ;;  %vm365_vm0 = vcmp.ne.f32.partialorder %v2546_v61, 0.0  ;;  %v1686_v2 = vsel %vm368_vm9, 1.0, %v2228_v1 }
  0x93   : > { %v417_v49 = vsel %vm403_vm10, %v1677_v48, -inf  ;;  %427 = vmax.xlane.f32.xlu1 %v426_v56  ;;  %v1683_v62 = vsel %vm365_vm0, 1.0, %v2228_v1  ;;  %v444_v4 = vsel %vm407_vm13, %v1686_v2, -inf  ;;  %v796_v1 = vsub.s32 %v793_v11, %v2667_v27 }
  0x94   : > { %418 = vmax.xlane.f32.xlu0 %v417_v49  ;;  %v435_v61 = vsel %vm403_vm10, %v1683_v62, -inf }
  0x97   : > { %433 = vmax.xlane.f32.xlu1 %v432_v59 }
  0x98   : > { %424 = vmax.xlane.f32.xlu0 %v423_v54 }
  0x9b   : > { %439 = vmax.xlane.f32.xlu1 %v438_v63 }
  0x9c   : > { %430 = vmax.xlane.f32.xlu0 %v429_v55 }
  0x9f   : > { %445 = vmax.xlane.f32.xlu1 %v444_v4 }
  0xa0   : > { %436 = vmax.xlane.f32.xlu0 %v435_v61 }
  0xa3   : > { %451 = vmax.xlane.f32.xlu1 %v450_v7 }
  0xa4   : > { %442 = vmax.xlane.f32.xlu0 %v441_v10 }
  0xa8   : > { %448 = vmax.xlane.f32.xlu0 %v447_v8 }
 0x145   : > { %v588_v14 = vpop.f32.mrb[0].mxu0 }
 0x146   : > { %v589_v15 = vadd.f32 %v1689_v12, %v588_v14  ;;  %v1788_v16 = vpop.f32.mrb[1].mxu0 }
 0x147   : > { %v742_v17 = vpop.f32.mrb[0].mxu1 }
 0x148   : > { %v797_v18 = vrot.slane %v589_v15, %v796_v1  ;;  %v744_v20 = vpop.f32.mrb[1].mxu1  ;;  %v790_v21 = vcombine.high %v589_v15, %v589_v15  ;;  %v743_v28 = vadd.f32 %v742_v17, %v669_v19 }
 0x149   : > { %v2736_v23 = vadd.f32 %v744_v20, %v2676_v35  ;;  %v1457_v20 = vld [vmem:[#allocation5 + $0x8] sm:$0xff] }
 0x14a   : > { %v805_v24 = vcombine.high %v797_v18, %v797_v18  ;;  %v813_v25 = vrot.slane %v797_v18, %v796_v1  ;;  %v804_v34 = vrot.slane %v790_v21, %v796_v1  ;;  %v1456_v18 = vld [vmem:[#allocation5] sm:$0xff] }
 0x14b   : > { %v748_v26 = vpop.f32.mrb[2].mxu1  ;;  %v1957_v21 = vpack.c.bf16 %v1457_v20, %v1456_v18 }
 0x14c   : > { %v842_v29 = vrot.slane %v813_v25, %v2730_v13  ;;  %v827_v27 = vrot.slane %v805_v24, %v796_v1  ;;  %v750_v32 = vpop.f32.mrb[3].mxu1  ;;  %v835_v36 = vcombine.high %v813_v25, %v813_v25  ;;  %v749_v30 = vadd.f32 %v748_v26, %v669_v19  ;;  %v1458_v24 = vld [vmem:[#allocation5 + $0x10] sm:$0xff]  ;;  %v1459_v25 = vld [vmem:[#allocation5 + $0x18] sm:$0xff] }
 0x14d   : > { %v2740_v33 = vadd.f32 %v750_v32, %v2676_v35  ;;  %v820_v41 = vrot.slane %v804_v34, %v796_v1  ;;  %v806_v48 = vcombine.high %v804_v34, %v804_v34  ;;  %1958 = vmatpush3.bf16.msra.mxu1 %v1957_v21  ;;  %v1960_v26 = vpack.c.bf16 %v1459_v25, %v1458_v24  ;;  %v1464_v34 = vld [vmem:[#allocation5 + $0x40] sm:$0xff] }
 0x14e   : > { %v879_v37 = vmul.f32 %v842_v29, %v743_v28  ;;  %v846_v38 = vrot.slane %v827_v27, %v2730_v13  ;;  %v837_v39 = vcombine.high %v827_v27, %v827_v27  ;;  %v850_v42 = vrot.slane %v835_v36, %v2730_v13  ;;  %1959 = vmatprep.subr.bf16.mxu1 %v2226_v0  ;;  %v1463_v29 = vld [vmem:[#allocation5 + $0x38] sm:$0xff]  ;;  %v413_v27 = vpop.xlane.xlu1 %412  ;;  %v1465_v36 = vld [vmem:[#allocation5 + $0x48] sm:$0xff] }
 0x14f   : > { %v754_v40 = vpop.f32.mrb[4].mxu1  ;;  %v858_v56 = vrot.slane %v820_v41, %v2730_v13  ;;  %v834_v59 = vrot.slane %v806_v48, %v796_v1  ;;  %v836_v3 = vcombine.high %v820_v41, %v820_v41  ;;  %v1471_v41 = vld [vmem:[#allocation5 + $0x78] sm:$0xff]  ;;  %vm455_vm0 = vcmp.eq.f32.partialorder %v413_v27, 0.0 }
 0x150   : > { %v880_v43 = vmul.f32 %v846_v38, %v749_v30  ;;  %v755_v44 = vadd.f32 %v754_v40, %v669_v19  ;;  %v756_v45 = vpop.f32.mrb[5].mxu1  ;;  %1821 = vmatprep.mubr.f32.mxu0 %v879_v37  ;;  %v854_v50 = vrot.slane %v837_v39, %v2730_v13  ;;  %v1466_v37 = vld [vmem:[#allocation5 + $0x50] sm:$0xff]  ;;  %v1969_v30 = vpack.c.bf16 %v1465_v36, %v1464_v34  ;;  %v1467_v38 = vld [vmem:[#allocation5 + $0x58] sm:$0xff]  ;;  %v406_v39 = vpop.xlane.xlu0 %405 }
 0x151   : > { %v2745_v46 = vadd.f32 %v756_v45, %v2676_v35  ;;  %v862_v61 = vrot.slane %v834_v59, %v2730_v13  ;;  %v866_v7 = vrot.slane %v836_v3, %v2730_v13  ;;  %v838_v9 = vcombine.high %v834_v59, %v834_v59  ;;  %1961 = vmatpush3.bf16.msra.mxu1 %v1960_v26 }
 0x152   : > { %v881_v51 = vmul.f32 %v850_v42, %v755_v44  ;;  %1822 = vmatmul.mubr.f32.vlgmr.msra.gmra.mrb[2].mxu0 %v880_v43  ;;  %1962 = vmatprep.subr.bf16.mxu1 %v2226_v0  ;;  %v416_v40 = vpop.xlane.xlu1 %415  ;;  %v1972_v42 = vpack.c.bf16 %v1467_v38, %v1466_v37  ;;  %v1468_v43 = vld [vmem:[#allocation5 + $0x60] sm:$0xff]  ;;  %v1469_v44 = vld [vmem:[#allocation5 + $0x68] sm:$0xff]  ;;  %vm453_vm9 = vcmp.eq.f32.partialorder %v406_v39, 0.0 }
 0x153   : > { %v760_v47 = vpop.f32.mrb[6].mxu1  ;;  %v870_v14 = vrot.slane %v838_v9, %v2730_v13  ;;  %v1460_v13 = vld [vmem:[#allocation5 + $0x20] sm:$0xff]  ;;  %v1975_v45 = vpack.c.bf16 %v1469_v44, %v1468_v43  ;;  %vm456_vm15 = vcmp.eq.f32.partialorder %v416_v40, 0.0 }
 0x154   : > { %v761_v31 = vadd.f32 %v760_v47, %v669_v19  ;;  %v762_v49 = vpop.f32.mrb[7].mxu1  ;;  %1824 = vmatprep.mubr.f32.mxu0 %v881_v51  ;;  %v410_v51 = vpop.xlane.xlu0 %409 }
 0x155   : > { %v2749_v52 = vadd.f32 %v762_v49, %v2676_v35  ;;  %vm454_vm11 = vcmp.eq.f32.partialorder %v410_v51, 0.0 }
 0x156   : > { %v882_v53 = vmul.f32 %v854_v50, %v761_v31  ;;  %v1470_v50 = vld [vmem:[#allocation5 + $0x70] sm:$0xff]  ;;  %v422_v47 = vpop.xlane.xlu1 %421 }
 0x157   : > { %v766_v54 = vpop.f32.mrb[8].mxu1  ;;  %v1978_v48 = vpack.c.bf16 %v1471_v41, %v1470_v50 }
 0x158   : > { %v767_v57 = vadd.f32 %v766_v54, %v669_v19  ;;  %v768_v58 = vpop.f32.mrb[9].mxu1  ;;  %1825 = vmatmul.mubr.f32.gmra.mrb[4].mxu0 %v882_v53  ;;  %v419_v31 = vpop.xlane.xlu0 %418 }
 0x159   : > { %v2753_v55 = vadd.f32 %v768_v58, %v2676_v35 }
 0x15a   : > { %v883_v60 = vmul.f32 %v858_v56, %v767_v57  ;;  %v428_v49 = vpop.xlane.xlu1 %427 }
 0x15b   : > { %v772_v62 = vpop.f32.mrb[10].mxu1  ;;  %vm460_vm12 = vcmp.eq.f32.partialorder %v428_v49, 0.0 }
 0x15c   : > { %v773_v63 = vadd.f32 %v772_v62, %v669_v19  ;;  %v774_v2 = vpop.f32.mrb[11].mxu1  ;;  %1827 = vmatprep.mubr.f32.mxu0 %v883_v60  ;;  %v425_v53 = vpop.xlane.xlu0 %424 }
 0x15d   : > { %v2757_v4 = vadd.f32 %v774_v2, %v2676_v35  ;;  %vm459_vm14 = vcmp.eq.f32.partialorder %v425_v53, 0.0 }
 0x15e   : > { %v884_v10 = vmul.f32 %v862_v61, %v773_v63  ;;  %v2774_v56 = vpop.xlane.xlu1 %433 }
 0x15f   : > { %v778_v5 = vpop.f32.mrb[12].mxu1 }
 0x160   : > { %v779_v6 = vadd.f32 %v778_v5, %v669_v19  ;;  %v780_v8 = vpop.f32.mrb[13].mxu1  ;;  %1828 = vmatmul.mubr.f32.gmra.mrb[6].mxu0 %v884_v10  ;;  %v2776_v59 = vpop.xlane.xlu0 %430 }
 0x161   : > { %v2761_v22 = vadd.f32 %v780_v8, %v2676_v35 }
 0x162   : > { %v885_v11 = vmul.f32 %v866_v7, %v779_v6  ;;  %v440_v62 = vpop.xlane.xlu1 %439 }
 0x163   : > { %v784_v12 = vpop.f32.mrb[14].mxu1 }
 0x164   : > { %v785_v1 = vadd.f32 %v784_v12, %v669_v19  ;;  %v786_v15 = vpop.f32.mrb[15].mxu1  ;;  %1830 = vmatprep.mubr.f32.mxu0 %v885_v11  ;;  %v1461_v19 = vld [vmem:[#allocation5 + $0x28] sm:$0xff] }
 0x165   : > { %v2765_v16 = vadd.f32 %v786_v15, %v2676_v35  ;;  %v1963_v28 = vpack.c.bf16 %v1461_v19, %v1460_v13  ;;  %v1462_v35 = vld [vmem:[#allocation5 + $0x30] sm:$0xff] }
 0x166   : > { %v886_v17 = vmul.f32 %v870_v14, %v785_v1  ;;  %v1966_v32 = vpack.c.bf16 %v1463_v29, %v1462_v35  ;;  %v437_v14 = vpop.xlane.xlu0 %436  ;;  %v2794_v18 = vpop.xlane.xlu1 %445 }
 0x167   : > { %1964 = vmatpush3.bf16.msra.mxu1 %v1963_v28 }
 0x168   : > { %1831 = vmatmul.mubr.f32.gmra.mrb[8].mxu0 %v886_v17  ;;  %1965 = vmatprep.subr.bf16.mxu1 %v2226_v0 }
 0x16a   : > { %v452_v43 = vpop.xlane.xlu1 %451 }
 0x16b   : > { %1967 = vmatpush3.bf16.msra.mxu1 %v1966_v32 }
 0x16c   : > { %1968 = vmatprep.subr.bf16.mxu1 %v2226_v0 }
 0x16f   : > { %1970 = vmatpush3.bf16.msra.mxu1 %v1969_v30  ;;  %v2812_v30 = vpop.xlane.xlu0 %442 }
 0x170   : > { %1971 = vmatprep.subr.bf16.mxu1 %v2226_v0 }
 0x173   : > { %1973 = vmatpush3.bf16.msra.mxu1 %v1972_v42 }
 0x174   : > { %1974 = vmatprep.subr.bf16.mxu1 %v2226_v0 }
 0x177   : > { %1976 = vmatpush3.bf16.msra.mxu1 %v1975_v45 }
 0x178   : > { %1977 = vmatprep.subr.bf16.mxu1 %v2226_v0 }
 0x17b   : > { %1979 = vmatpush3.bf16.msra.mxu1 %v1978_v48 }
 0x225   : > { %v1823_v54 = vpop.f32.mrb[2].mxu0 }
 0x226   : > { %v1049_v57 = vrot.slane %v1823_v54, 7  ;;  %v969_v58 = vpop.f32.mrb[3].mxu0 }
 0x227   : > { %v1048_v60 = vrot.slane %v969_v58, 7 }
 0x228   : > { %v2778_v63 = vsel %vm455_vm0, -inf, %v1049_v57  ;;  %v2780_v0 = vsel %vm456_vm15, -inf, %v1049_v57  ;;  %vm458_vm15 = vcmp.eq.f32.partialorder %v422_v47, 0.0  ;;  %vm457_vm0 = vcmp.eq.f32.partialorder %v419_v31, 0.0 }
 0x229   : > { %v1089_v61 = vsel %vm403_vm10, %v2778_v63, -inf  ;;  %v1090_v2 = vsel %vm407_vm13, %v2780_v0, -inf  ;;  %v2786_v3 = vsel %vm453_vm9, -inf, %v1048_v60  ;;  %v2788_v10 = vsel %vm454_vm11, -inf, %v1048_v60 }
 0x22a   : > { %v1091_v5 = vmax.f32 %v1089_v61, %v1090_v2  ;;  %v1080_v6 = vsel %vm403_vm10, %v2786_v3, -inf  ;;  %v1081_v7 = vsel %vm407_vm13, %v2788_v10, -inf  ;;  %vm464_vm9 = vcmp.eq.f32.partialorder %v440_v62, 0.0 }
 0x22b   : > { %v1082_v8 = vmax.f32 %v1080_v6, %v1081_v7  ;;  %v1826_v9 = vpop.f32.mrb[4].mxu0  ;;  %vm463_vm11 = vcmp.eq.f32.partialorder %v437_v14, 0.0 }
 0x22c   : > { %v1092_v11 = vrot.slane %v1091_v5, 4  ;;  %v1051_v12 = vrot.slane %v1826_v9, 7  ;;  %v979_v1 = vpop.f32.mrb[5].mxu0 }
 0x22d   : > { %v1083_v15 = vrot.slane %v1082_v8, 4  ;;  %v1050_v17 = vrot.slane %v979_v1, 7 }
 0x22e   : > { %v1093_v20 = vmax.f32 %v1091_v5, %v1092_v11  ;;  %v2796_v21 = vsel %vm460_vm12, -inf, %v1051_v12  ;;  %v2798_v24 = vsel %vm459_vm14, -inf, %v1051_v12  ;;  %vm462_vm12 = vcmp.eq.f32.partialorder %v2774_v56, 0.0  ;;  %v449_v11 = vpop.xlane.xlu0 %448 }
 0x22f   : > { %v1084_v25 = vmax.f32 %v1082_v8, %v1083_v15  ;;  %v1108_v26 = vsel %vm407_vm13, %v2796_v21, -inf  ;;  %v2802_v13 = vsel %vm457_vm0, -inf, %v1050_v17  ;;  %v2804_v19 = vsel %vm458_vm15, -inf, %v1050_v17 }
 0x230   : > { %v1094_v28 = vrot.slane %v1093_v20, 2  ;;  %v1098_v35 = vsel %vm403_vm10, %v2802_v13, -inf  ;;  %v1099_v29 = vsel %vm407_vm13, %v2804_v19, -inf  ;;  %v1107_v27 = vsel %vm403_vm10, %v2798_v24, -inf }
 0x231   : > { %v1085_v32 = vrot.slane %v1084_v25, 2  ;;  %v1100_v34 = vmax.f32 %v1098_v35, %v1099_v29  ;;  %v1109_v36 = vmax.f32 %v1107_v27, %v1108_v26  ;;  %vm461_vm14 = vcmp.eq.f32.partialorder %v2776_v59, 0.0 }
 0x232   : > { %v1095_v37 = vmax.f32 %v1093_v20, %v1094_v28  ;;  %vm468_vm15 = vcmp.eq.f32.partialorder %v452_v43, 0.0  ;;  %vm466_vm0 = vcmp.eq.f32.partialorder %v2794_v18, 0.0 }
 0x233   : > { %v1086_v38 = vmax.f32 %v1084_v25, %v1085_v32  ;;  %v1101_v39 = vrot.slane %v1100_v34, 4  ;;  %v1110_v40 = vrot.slane %v1109_v36, 4  ;;  %v1829_v42 = vpop.f32.mrb[6].mxu0 }
 0x234   : > { %v1096_v44 = vrot.slane %v1095_v37, 1  ;;  %v1053_v45 = vrot.slane %v1829_v42, 7  ;;  %v989_v51 = vpop.f32.mrb[7].mxu0 }
 0x235   : > { %v1087_v50 = vrot.slane %v1086_v38, 1  ;;  %v1102_v41 = vmax.f32 %v1100_v34, %v1101_v39  ;;  %v1111_v47 = vmax.f32 %v1109_v36, %v1110_v40  ;;  %v1052_v48 = vrot.slane %v989_v51, 7 }
 0x236   : > { %v1097_v31 = vmax.f32 %v1095_v37, %v1096_v44  ;;  %v2817_v49 = vsel %vm464_vm9, -inf, %v1053_v45  ;;  %v2819_v53 = vsel %vm463_vm11, -inf, %v1053_v45  ;;  %vm465_vm9 = vcmp.eq.f32.partialorder %v2812_v30, 0.0 }
 0x237   : > { %v1088_v54 = vmax.f32 %v1086_v38, %v1087_v50  ;;  %v1103_v57 = vrot.slane %v1102_v41, 2  ;;  %v1112_v58 = vrot.slane %v1111_v47, 2  ;;  %v1126_v60 = vsel %vm407_vm13, %v2817_v49, -inf }
 0x238   : > { %v1154_v61 = vsub.f32 %v2778_v63, %v1097_v31  ;;  %v1155_v2 = vsub.f32 %v2780_v0, %v1097_v31  ;;  %v2827_v5 = vsel %vm461_vm14, -inf, %v1052_v48  ;;  %v2831_v62 = vsel %vm462_vm12, -inf, %v1052_v48 }
 0x239   : > { %v1152_v6 = vsub.f32 %v2786_v3, %v1088_v54  ;;  %v1153_v7 = vsub.f32 %v2788_v10, %v1088_v54  ;;  %v1104_v8 = vmax.f32 %v1102_v41, %v1103_v57  ;;  %v1113_v9 = vmax.f32 %v1111_v47, %v1112_v58 }
 0x23a   : > { %v1172_v12 = vmul.f32 1.442695, %v1154_v61  ;;  %v1174_v1 = vmul.f32 1.442695, %v1155_v2  ;;  %v1116_v63 = vsel %vm403_vm10, %v2827_v5, -inf  ;;  %v1117_v59 = vsel %vm407_vm13, %v2831_v62, -inf }
 0x23b   : > { %v1168_v56 = vmul.f32 1.442695, %v1152_v6  ;;  %v1170_v0 = vmul.f32 1.442695, %v1153_v7  ;;  %v1105_v3 = vrot.slane %v1104_v8, 1  ;;  %v1114_v14 = vrot.slane %v1113_v9, 1 }
 0x23c   : > { %2046 = vpow2.f32 %v1172_v12  ;;  %v1118_v10 = vmax.f32 %v1116_v63, %v1117_v59  ;;  %v1125_v15 = vsel %vm403_vm10, %v2819_v53, -inf  ;;  %v1832_v17 = vpop.f32.mrb[8].mxu0  ;;  %vm467_vm11 = vcmp.eq.f32.partialorder %v449_v11, 0.0 }
 0x23d   : > { %2048 = vpow2.f32 %v1174_v1  ;;  %v1106_v20 = vmax.f32 %v1104_v8, %v1105_v3  ;;  %v1115_v25 = vmax.f32 %v1113_v9, %v1114_v14  ;;  %v1127_v26 = vmax.f32 %v1125_v15, %v1126_v60  ;;  %v999_v28 = vpop.f32.mrb[9].mxu0 }
 0x23e   : > { %2050 = vpow2.f32 %v1168_v56  ;;  %v1119_v35 = vrot.slane %v1118_v10, 4  ;;  %v1055_v29 = vrot.slane %v1832_v17, 7  ;;  %v1054_v27 = vrot.slane %v999_v28, 7 }
 0x23f   : > { %2052 = vpow2.f32 %v1170_v0  ;;  %v1156_v32 = vsub.f32 %v2802_v13, %v1106_v20  ;;  %v1157_v34 = vsub.f32 %v2804_v19, %v1106_v20  ;;  %v1158_v36 = vsub.f32 %v2798_v24, %v1115_v25 }
 0x240   : > { %v1159_v37 = vsub.f32 %v2796_v21, %v1115_v25  ;;  %v1120_v38 = vmax.f32 %v1118_v10, %v1119_v35  ;;  %v1128_v39 = vrot.slane %v1127_v26, 4  ;;  %v2848_v40 = vsel %vm468_vm15, -inf, %v1055_v29 }
 0x241   : > { %v1176_v42 = vmul.f32 1.442695, %v1156_v32  ;;  %v1178_v44 = vmul.f32 1.442695, %v1157_v34  ;;  %v1180_v45 = vmul.f32 1.442695, %v1158_v36 }
 0x242   : > { %v1182_v51 = vmul.f32 1.442695, %v1159_v37  ;;  %v1121_v50 = vrot.slane %v1120_v38, 2  ;;  %v1129_v41 = vmax.f32 %v1127_v26, %v1128_v39  ;;  %v1144_v13 = vsel %vm407_vm13, %v2848_v40, -inf }
 0x243   : > { %2054 = vpow2.f32 %v1176_v42  ;;  %v2854_v24 = vsel %vm465_vm9, -inf, %v1054_v27  ;;  %v2858_v21 = vsel %vm466_vm0, -inf, %v1054_v27  ;;  %v2861_v19 = vsel %vm467_vm11, -inf, %v1055_v29 }
 0x244   : > { %2056 = vpow2.f32 %v1178_v44  ;;  %v1122_v43 = vmax.f32 %v1120_v38, %v1121_v50  ;;  %v1130_v47 = vrot.slane %v1129_v41, 2  ;;  %v1134_v48 = vsel %vm403_vm10, %v2854_v24, -inf }
 0x245   : > { %2058 = vpow2.f32 %v1180_v45  ;;  %v1135_v31 = vsel %vm407_vm13, %v2858_v21, -inf  ;;  %v1143_v30 = vsel %vm403_vm10, %v2861_v19, -inf }
 0x246   : > { %v2869_v54 = vpop.eup %2046  ;;  %2060 = vpow2.f32 %v1182_v51  ;;  %v1123_v18 = vrot.slane %v1122_v43, 1  ;;  %v1131_v57 = vmax.f32 %v1129_v41, %v1130_v47  ;;  %v1136_v58 = vmax.f32 %v1134_v48, %v1135_v31 }
 0x247   : > { %v2871_v60 = vpop.eup %2048  ;;  %v1219_v61 = vrot.slane %v2869_v54, 1  ;;  %v1145_v2 = vmax.f32 %v1143_v30, %v1144_v13 }
 0x248   : > { %v2874_v6 = vpop.eup %2050  ;;  %v1220_v7 = vrot.slane %v2871_v60, 1  ;;  %v1124_v8 = vmax.f32 %v1122_v43, %v1123_v18  ;;  %v1132_v9 = vrot.slane %v1131_v57, 1  ;;  %v1137_v11 = vrot.slane %v1136_v58, 4 }
 0x249   : > { %v2877_v12 = vpop.eup %2052  ;;  %v1216_v1 = vrot.slane %v2874_v6, 1  ;;  %v1146_v63 = vrot.slane %v1145_v2, 4 }
 0x24a   : > { %v1221_v59 = vsel %vm600_vm8, %v1219_v61, %v1220_v7  ;;  %v1217_v56 = vrot.slane %v2877_v12, 1  ;;  %v1160_v0 = vsub.f32 %v2827_v5, %v1124_v8  ;;  %v1161_v3 = vsub.f32 %v2831_v62, %v1124_v8 }
 0x24b   : > { %v1254_v14 = vrot.slane %v1221_v59, 4  ;;  %v1133_v10 = vmax.f32 %v1131_v57, %v1132_v9  ;;  %v1138_v15 = vmax.f32 %v1136_v58, %v1137_v11  ;;  %v1147_v17 = vmax.f32 %v1145_v2, %v1146_v63 }
 0x24c   : > { %v1218_v20 = vsel %vm600_vm8, %v1216_v1, %v1217_v56  ;;  %v1184_v25 = vmul.f32 1.442695, %v1160_v0  ;;  %v1186_v26 = vmul.f32 1.442695, %v1161_v3 }
 0x24d   : > { %v2885_v28 = vpop.eup %2054  ;;  %v1255_v35 = vadd.f32 %v1254_v14, %v1221_v59  ;;  %v1248_v29 = vrot.slane %v1218_v20, 4  ;;  %v1162_v27 = vsub.f32 %v2819_v53, %v1133_v10  ;;  %v1163_v32 = vsub.f32 %v2817_v49, %v1133_v10 }
 0x24e   : > { %v2889_v34 = vpop.eup %2056  ;;  %v1222_v5 = vrot.slane %v2885_v28, 1  ;;  %2062 = vpow2.f32 %v1184_v25  ;;  %v1139_v62 = vrot.slane %v1138_v15, 2  ;;  %v1148_v36 = vrot.slane %v1147_v17, 2 }
 0x24f   : > { %v2892_v37 = vpop.eup %2058  ;;  %v1256_v38 = vrot.slane %v1255_v35, 2  ;;  %v1249_v39 = vadd.f32 %v1248_v29, %v1218_v20  ;;  %v1223_v42 = vrot.slane %v2889_v34, 1  ;;  %2064 = vpow2.f32 %v1186_v26 }
 0x250   : > { %v2895_v44 = vpop.eup %2060  ;;  %v1225_v53 = vrot.slane %v2892_v37, 1  ;;  %v1188_v45 = vmul.f32 1.442695, %v1162_v27  ;;  %v1190_v49 = vmul.f32 1.442695, %v1163_v32  ;;  %v1140_v51 = vmax.f32 %v1138_v15, %v1139_v62 }
 0x251   : > { %v1257_v50 = vadd.f32 %v1256_v38, %v1255_v35  ;;  %v1250_v41 = vrot.slane %v1249_v39, 2  ;;  %v1224_v13 = vsel %vm600_vm8, %v1222_v5, %v1223_v42  ;;  %v1226_v43 = vrot.slane %v2895_v44, 1 }
 0x252   : > { %v1260_v47 = vrot.slane %v1224_v13, 4  ;;  %2066 = vpow2.f32 %v1188_v45  ;;  %v1141_v48 = vrot.slane %v1140_v51, 1  ;;  %v1149_v31 = vmax.f32 %v1147_v17, %v1148_v36 }
 0x253   : > { %v1258_v30 = vrot.slane %v1257_v50, 1  ;;  %v1251_v18 = vadd.f32 %v1250_v41, %v1249_v39  ;;  %v1227_v57 = vsel %vm600_vm8, %v1225_v53, %v1226_v43  ;;  %2068 = vpow2.f32 %v1190_v49 }
 0x254   : > { %v1261_v58 = vadd.f32 %v1260_v47, %v1224_v13  ;;  %v1266_v61 = vrot.slane %v1227_v57, 4  ;;  %v1142_v2 = vmax.f32 %v1140_v51, %v1141_v48  ;;  %v1150_v7 = vrot.slane %v1149_v31, 1 }
 0x255   : > { %v1259_v8 = vadd.f32 %v1258_v30, %v1257_v50  ;;  %v1252_v9 = vrot.slane %v1251_v18, 1  ;;  %v1329_v13 = vrot.slane %v2740_v33, 7  ;;  %v1330_v33 = vrot.slane %v2745_v46, 7 }
 0x256   : > { %v1262_v11 = vrot.slane %v1261_v58, 2  ;;  %v1267_v1 = vadd.f32 %v1266_v61, %v1227_v57  ;;  %v1164_v63 = vsub.f32 %v2854_v24, %v1142_v2  ;;  %v1165_v59 = vsub.f32 %v2858_v21, %v1142_v2 }
 0x257   : > { %2070 = vrcp.f32 %v1259_v8  ;;  %v1253_v56 = vadd.f32 %v1252_v9, %v1251_v18  ;;  %v1151_v0 = vmax.f32 %v1149_v31, %v1150_v7  ;;  %v1328_v31 = vrot.slane %v2736_v23, 7 }
 0x258   : > { %v2903_v3 = vpop.eup %2062  ;;  %v1263_v14 = vadd.f32 %v1262_v11, %v1261_v58  ;;  %v1268_v10 = vrot.slane %v1267_v1, 2  ;;  %v1192_v15 = vmul.f32 1.442695, %v1164_v63  ;;  %v1194_v17 = vmul.f32 1.442695, %v1165_v59 }
 0x259   : > { %v2905_v20 = vpop.eup %2064  ;;  %2072 = vrcp.f32 %v1253_v56  ;;  %v1228_v25 = vrot.slane %v2903_v3, 1  ;;  %v1166_v26 = vsub.f32 %v2861_v19, %v1151_v0  ;;  %v1167_v24 = vsub.f32 %v2848_v40, %v1151_v0 }
 0x25a   : > { %v1264_v35 = vrot.slane %v1263_v14, 1  ;;  %v1269_v21 = vadd.f32 %v1268_v10, %v1267_v1  ;;  %v1229_v29 = vrot.slane %v2905_v20, 1  ;;  %2074 = vpow2.f32 %v1192_v15 }
 0x25b   : > { %2076 = vpow2.f32 %v1194_v17  ;;  %v1196_v27 = vmul.f32 1.442695, %v1166_v26  ;;  %v1198_v32 = vmul.f32 1.442695, %v1167_v24  ;;  %v1331_v56 = vrot.slane %v2749_v52, 7 }
 0x25c   : > { %v2911_v5 = vpop.eup %2066  ;;  %v1265_v62 = vadd.f32 %v1264_v35, %v1263_v14  ;;  %v1270_v36 = vrot.slane %v1269_v21, 1  ;;  %v1230_v38 = vsel %vm600_vm8, %v1228_v25, %v1229_v29 }
 0x25d   : > { %v2914_v39 = vpop.eup %2068  ;;  %v1272_v42 = vrot.slane %v1230_v38, 4  ;;  %v1231_v19 = vrot.slane %v2911_v5, 1  ;;  %2078 = vpow2.f32 %v1196_v27 }
 0x25e   : > { %2080 = vrcp.f32 %v1265_v62  ;;  %v1271_v40 = vadd.f32 %v1270_v36, %v1269_v21  ;;  %v1232_v53 = vrot.slane %v2914_v39, 1 }
 0x25f   : > { %v1273_v45 = vadd.f32 %v1272_v42, %v1230_v38  ;;  %2082 = vpow2.f32 %v1198_v32 }
 0x260   : > { %2084 = vrcp.f32 %v1271_v40  ;;  %v1233_v49 = vsel %vm600_vm8, %v1231_v19, %v1232_v53 }
 0x261   : > { %v2071_v51 = vpop.eup %2070  ;;  %v1274_v50 = vrot.slane %v1273_v45, 2  ;;  %v1278_v41 = vrot.slane %v1233_v49, 4 }
 0x262   : > { %v1306_v43 = vmul.f32 %v2071_v51, %v2869_v54  ;;  %v1307_v47 = vmul.f32 %v2071_v51, %v2871_v60 }
 0x263   : > { %v2073_v48 = vpop.eup %2072  ;;  %v1275_v30 = vadd.f32 %v1274_v50, %v1273_v45  ;;  %v1279_v18 = vadd.f32 %v1278_v41, %v1233_v49 }
 0x264   : > { %v2923_v57 = vpop.eup %2074  ;;  %v1346_v58 = vmul.f32 %v1329_v13, %v1306_v43  ;;  %v1347_v61 = vmul.f32 %v1329_v13, %v1307_v47  ;;  %v1304_v2 = vmul.f32 %v2073_v48, %v2874_v6  ;;  %v1305_v7 = vmul.f32 %v2073_v48, %v2877_v12 }
 0x265   : > { %v2927_v8 = vpop.eup %2076  ;;  %v1276_v54 = vrot.slane %v1275_v30, 1  ;;  %v1280_v9 = vrot.slane %v1279_v18, 2  ;;  %v1234_v60 = vrot.slane %v2923_v57, 1 }
 0x266   : > { %v1379_v11 = vrot.slane %v1346_v58, 1  ;;  %v1380_v23 = vrot.slane %v1347_v61, 1  ;;  %v1344_v1 = vmul.f32 %v1328_v31, %v1304_v2  ;;  %v1345_v63 = vmul.f32 %v1328_v31, %v1305_v7 }
 0x267   : > { %v2931_v59 = vpop.eup %2078  ;;  %v1277_v0 = vadd.f32 %v1276_v54, %v1275_v30  ;;  %v1281_v6 = vadd.f32 %v1280_v9, %v1279_v18  ;;  %v1235_v12 = vrot.slane %v2927_v8, 1  ;;  %v1332_v7 = vrot.slane %v2753_v55, 7 }
 0x268   : > { %v2081_v14 = vpop.eup %2080  ;;  %v1381_v10 = vsel %vm600_vm8, %v1379_v11, %v1380_v23  ;;  %v1376_v46 = vrot.slane %v1344_v1, 1  ;;  %v1377_v15 = vrot.slane %v1345_v63, 1  ;;  %v1237_v17 = vrot.slane %v2931_v59, 1 }
 0x269   : > { %v2937_v25 = vpop.eup %2082  ;;  %v1414_v26 = vrot.slane %v1381_v10, 4  ;;  %v1308_v24 = vmul.f32 %v2081_v14, %v2885_v28  ;;  %v1309_v35 = vmul.f32 %v2081_v14, %v2889_v34  ;;  %2086 = vrcp.f32 %v1277_v0 }
 0x26a   : > { %v2085_v52 = vpop.eup %2084  ;;  %v1378_v21 = vsel %vm600_vm8, %v1376_v46, %v1377_v15  ;;  %v1282_v29 = vrot.slane %v1281_v6, 1  ;;  %v1236_v27 = vsel %vm600_vm8, %v1234_v60, %v1235_v12  ;;  %v1238_v32 = vrot.slane %v2937_v25, 1 }
 0x26b   : > { %v1415_v62 = vadd.f32 %v1414_v26, %v1381_v10  ;;  %v1408_v36 = vrot.slane %v1378_v21, 4  ;;  %v1348_v38 = vmul.f32 %v1330_v33, %v1308_v24  ;;  %v1349_v42 = vmul.f32 %v1330_v33, %v1309_v35 }
 0x26c   : > { %v1310_v19 = vmul.f32 %v2085_v52, %v2892_v37  ;;  %v1311_v40 = vmul.f32 %v2085_v52, %v2895_v44  ;;  %v1283_v28 = vadd.f32 %v1282_v29, %v1281_v6  ;;  %v1284_v53 = vrot.slane %v1236_v27, 4 }
 0x26d   : > { %v1416_v34 = vrot.slane %v1415_v62, 2  ;;  %v1409_v45 = vadd.f32 %v1408_v36, %v1378_v21  ;;  %v1382_v49 = vrot.slane %v1348_v38, 1  ;;  %v1383_v51 = vrot.slane %v1349_v42, 1 }
 0x26e   : > { %v1350_v50 = vmul.f32 %v1331_v56, %v1310_v19  ;;  %v1351_v41 = vmul.f32 %v1331_v56, %v1311_v40  ;;  %2088 = vrcp.f32 %v1283_v28  ;;  %v1285_v13 = vadd.f32 %v1284_v53, %v1236_v27 }
 0x26f   : > { %v1417_v43 = vadd.f32 %v1416_v34, %v1415_v62  ;;  %v1410_v47 = vrot.slane %v1409_v45, 2  ;;  %v1384_v48 = vsel %vm600_vm8, %v1382_v49, %v1383_v51  ;;  %v1239_v31 = vsel %vm600_vm8, %v1237_v17, %v1238_v32 }
 0x270   : > { %v1420_v30 = vrot.slane %v1384_v48, 4  ;;  %v1385_v37 = vrot.slane %v1350_v50, 1  ;;  %v1386_v18 = vrot.slane %v1351_v41, 1  ;;  %v1286_v44 = vrot.slane %v1285_v13, 2 }
 0x271   : > { %v1411_v58 = vadd.f32 %v1410_v47, %v1409_v45  ;;  %v1290_v61 = vrot.slane %v1239_v31, 4  ;;  %v1418_v2 = vrot.slane %v1417_v43, 1  ;;  %v1333_v24 = vrot.slane %v2757_v4, 7 }
 0x272   : > { %v1421_v33 = vadd.f32 %v1420_v30, %v1384_v48  ;;  %v1387_v54 = vsel %vm600_vm8, %v1385_v37, %v1386_v18  ;;  %v1287_v9 = vadd.f32 %v1286_v44, %v1285_v13  ;;  %v1334_v30 = vrot.slane %v2761_v22, 7 }
 0x273   : > { %v2087_v60 = vpop.eup %2086  ;;  %v1426_v11 = vrot.slane %v1387_v54, 4  ;;  %v1291_v23 = vadd.f32 %v1290_v61, %v1239_v31  ;;  %v1412_v1 = vrot.slane %v1411_v58, 1  ;;  %v1419_v63 = vadd.f32 %v1418_v2, %v1417_v43 }
 0x274   : > { %v1312_v56 = vmul.f32 %v2087_v60, %v2903_v3  ;;  %v1313_v0 = vmul.f32 %v2087_v60, %v2905_v20  ;;  %v1288_v6 = vrot.slane %v1287_v9, 1  ;;  %v1422_v12 = vrot.slane %v1421_v33, 2 }
 0x275   : > { %v1427_v14 = vadd.f32 %v1426_v11, %v1387_v54  ;;  %v1292_v10 = vrot.slane %v1291_v23, 2  ;;  %v1413_v46 = vadd.f32 %v1412_v1, %v1411_v58 }
 0x276   : > { %v1352_v15 = vmul.f32 %v1332_v7, %v1312_v56  ;;  %v1353_v55 = vmul.f32 %v1332_v7, %v1313_v0  ;;  %v1289_v17 = vadd.f32 %v1288_v6, %v1287_v9  ;;  %v1423_v26 = vadd.f32 %v1422_v12, %v1421_v33 }
 0x277   : > { %v1293_v35 = vadd.f32 %v1292_v10, %v1291_v23  ;;  %v1428_v52 = vrot.slane %v1427_v14, 2  ;;  %v1487_v21 = vsel %vm501_vm1, %v1419_v63, %v1413_v46  ;;  %v1335_v9 = vrot.slane %v2765_v16, 7 }
 0x278   : > { %v2089_v29 = vpop.eup %2088  ;;  %v1388_v27 = vrot.slane %v1352_v15, 1  ;;  %v1389_v3 = vrot.slane %v1353_v55, 1  ;;  %2090 = vrcp.f32 %v1289_v17  ;;  %v1424_v20 = vrot.slane %v1423_v26, 1 }
 0x279   : > { %v1314_v32 = vmul.f32 %v2089_v29, %v2911_v5  ;;  %v1315_v62 = vmul.f32 %v2089_v29, %v2914_v39  ;;  %v1294_v36 = vrot.slane %v1293_v35, 1  ;;  %v1429_v38 = vadd.f32 %v1428_v52, %v1427_v14 }
 0x27a   : > { %v1390_v42 = vsel %vm600_vm8, %v1388_v27, %v1389_v3  ;;  %v1425_v19 = vadd.f32 %v1424_v20, %v1423_v26  ;;  %v1690_v3 = vld [vmem:[%s3029_s7] ss:$0 sm:$0xff] }
 0x27b   : > { %v1354_v40 = vmul.f32 %v1333_v24, %v1314_v32  ;;  %v1355_v4 = vmul.f32 %v1333_v24, %v1315_v62  ;;  %v1295_v28 = vadd.f32 %v1294_v36, %v1293_v35  ;;  %v1430_v53 = vrot.slane %v1429_v38, 1 }
 0x27c   : > { %v1432_v34 = vrot.slane %v1390_v42, 4  ;;  %v1488_v45 = vsel %vm504_vm2, %v1425_v19, %v1487_v21 }
 0x27d   : > { %v1391_v49 = vrot.slane %v1354_v40, 1  ;;  %v1392_v51 = vrot.slane %v1355_v4, 1  ;;  %2092 = vrcp.f32 %v1295_v28  ;;  %v1431_v50 = vadd.f32 %v1430_v53, %v1429_v38 }
 0x27e   : > { %v1433_v41 = vadd.f32 %v1432_v34, %v1390_v42 }
 0x27f   : > { %v1393_v5 = vsel %vm600_vm8, %v1391_v49, %v1392_v51  ;;  %v1489_v39 = vsel %vm507_vm3, %v1431_v50, %v1488_v45 }
 0x280   : > { %v1434_v13 = vrot.slane %v1433_v41, 2  ;;  %v1438_v43 = vrot.slane %v1393_v5, 4 }
 0x282   : > { %v2091_v47 = vpop.eup %2090  ;;  %v1435_v48 = vadd.f32 %v1434_v13, %v1433_v41  ;;  %v1439_v31 = vadd.f32 %v1438_v43, %v1393_v5 }
 0x283   : > { %v1316_v37 = vmul.f32 %v2091_v47, %v2923_v57  ;;  %v1317_v18 = vmul.f32 %v2091_v47, %v2927_v8 }
 0x284   : > { %v1436_v44 = vrot.slane %v1435_v48, 1  ;;  %v1440_v58 = vrot.slane %v1439_v31, 2 }
 0x285   : > { %v1356_v61 = vmul.f32 %v1334_v30, %v1316_v37  ;;  %v1357_v2 = vmul.f32 %v1334_v30, %v1317_v18 }
 0x286   : > { %v1437_v7 = vadd.f32 %v1436_v44, %v1435_v48  ;;  %v1441_v33 = vadd.f32 %v1440_v58, %v1439_v31 }
 0x287   : > { %v2093_v54 = vpop.eup %2092  ;;  %v1394_v60 = vrot.slane %v1356_v61, 1  ;;  %v1395_v11 = vrot.slane %v1357_v2, 1 }
 0x288   : > { %v1318_v23 = vmul.f32 %v2093_v54, %v2931_v59  ;;  %v1319_v1 = vmul.f32 %v2093_v54, %v2937_v25  ;;  %v1442_v22 = vrot.slane %v1441_v33, 1  ;;  %v1490_v57 = vsel %vm510_vm4, %v1437_v7, %v1489_v39 }
 0x289   : > { %v1396_v8 = vsel %vm600_vm8, %v1394_v60, %v1395_v11 }
 0x28a   : > { %v1358_v63 = vmul.f32 %v1335_v9, %v1318_v23  ;;  %v1359_v56 = vmul.f32 %v1335_v9, %v1319_v1  ;;  %v1443_v0 = vadd.f32 %v1442_v22, %v1441_v33  ;;  %v1444_v6 = vrot.slane %v1396_v8, 4 }
 0x28c   : > { %v1397_v12 = vrot.slane %v1358_v63, 1  ;;  %v1398_v14 = vrot.slane %v1359_v56, 1  ;;  %v1445_v10 = vadd.f32 %v1444_v6, %v1396_v8  ;;  %v1491_v16 = vsel %vm513_vm5, %v1443_v0, %v1490_v57 }
 0x28e   : > { %v1399_v46 = vsel %vm600_vm8, %v1397_v12, %v1398_v14  ;;  %v1446_v59 = vrot.slane %v1445_v10, 2 }
 0x28f   : > { %v1450_v25 = vrot.slane %v1399_v46, 4 }
 0x290   : > { %v1447_v15 = vadd.f32 %v1446_v59, %v1445_v10 }
 0x291   : > { %v1451_v55 = vadd.f32 %v1450_v25, %v1399_v46 }
 0x292   : > { %v1448_v17 = vrot.slane %v1447_v15, 1 }
 0x293   : > { %v1452_v26 = vrot.slane %v1451_v55, 2 }
 0x294   : > { %v1449_v24 = vadd.f32 %v1448_v17, %v1447_v15 }
 0x295   : > { %v1453_v35 = vadd.f32 %v1452_v26, %v1451_v55 }
 0x296   : > { %v1492_v52 = vsel %vm516_vm6, %v1449_v24, %v1491_v16 }
 0x297   : > { %v1454_v21 = vrot.slane %v1453_v35, 1 }
 0x299   : > { %v1455_v29 = vadd.f32 %v1454_v21, %v1453_v35 }
 0x29b   : > { %v1493_v27 = vsel %vm519_vm7, %v1455_v29, %v1492_v52 }
 0x29c   : > { %1866 = vmatmul.mubr.f32.vlgmr.msra.gmra.mrb[16].mxu1 %v1493_v27 }
 0x36f   : > { %v1561_v20 = vpop.f32.mrb[16].mxu1 }
 0x370   : > { %v1562_v32 = vadd.f32 %v1690_v3, %v1561_v20  ;;  %v1867_v62 = vpop.f32.mrb[17].mxu1 }
 0x372   : > { %1565 = vst [vmem:[%s331_s12] sm:$0xff] %v1562_v32 }
 0x373   : > { %2163 = shalt.err (!%p2160_p11)
}
 0x374   : > { %s2164_s25 = scalar_lea.hbm %s2980_s22, 128  ;;  %s2168_s13 = scalar_lea.hbm %s3030_s8, 256 }
 0x375   : > { %p2165_p13 = scmp.ne.s32.totalorder %s2980_s22, %s2164_s25  ;;  %p2169_p6 = scmp.lt.u32.totalorder %s2980_s22, %s3030_s8 }
 0x376   : > { %p2170_p9 = scmp.lt.u32.totalorder %s2168_s13, %s2164_s25  ;;  %p2172_p10 = scmp.lt.u32.totalorder %s2164_s25, %s2980_s22 }
 0x377   : > { %p2166_p5 = pnand %p2165_p13, %p3047_p1 }
 0x378   : > { %p2171_p12 = por %p2170_p9, %p2169_p6 }
 0x379   : > { %p2167_p0 = pneg %p2166_p5 }
 0x37a   : > { %p2173_p2 = por %p2172_p10, %p2171_p12 }
 0x37c   : > { %p2174_p3 = pnand %p2173_p2, %p2167_p0 }
 0x37e   : > { %2177 = shalt.err (!%p2174_p3)
}
 0x37f   : > { %1988 = dma.vmem_to_hbm [thread:$0]  (%p3047_p1), %s2982_s29, 128, %s2980_s22, %s1567_s21  }
 0x380 PF: > { %p2005_p4 = scmp.ge.s32.totalorder %s2220_s30, 2  ;;  %s1592_s12 = sand.u32 1, %s2208_s27  }
 0x381   : > { %p3048_p7 = scmp.ne.s32.totalorder %s3038_s16, 0  ;;  %s1593_s14 = scalar_lea.sflag [#allocation4], %s1592_s12 }
 0x383   : > { %p1998_p8 = pnand %p2005_p4, %p3048_p7 }
 0x385   : > { %2203 = dma.done.wait (!%p1998_p8), %s1593_s14, 128  }
 0x386   : > { %2205 = vsyncadd (!%p1998_p8), %s1593_s14, 4294967168  ;;  %s3049_s20 = sld [smem:[#allocation11_spill]]  ;;  %s3050_s29 = sld [smem:[#allocation12_spill]] }
 0x387   : > { %p20_p11 = scmp.ge.s32.totalorder %s2301_s11, 4   ;;  %s3051_s27 = smov %s2212_s28 }
 0x388   : > { %s3053_s30 = smov %s2301_s11 }
 0x389   :  { %22 = sbr.rel (!%p20_p11) target bundleno = 5 (0x5), region = 96 }
 0x38c   : > { %s3052_s28 = smov %s3049_s20 }
 0x390   :  { %1598 = vsyncpa [#allocation3], 1 }
 0x391   :  { %1600 = vsyncpa [#allocation3 + $0x1], 1 }
 0x392   :  { %1601 = vsyncpa [#allocation6], 1 }
 0x393   :  { %1602 = vsyncpa [#allocation4], 1 }
 0x394   :  { %1604 = vsyncpa [#allocation4 + $0x1], 1 }

</bundles_post_ra>
